<compile_context>
chip_gen: v5e
topology: v5e:2x2
jax: 0.10.0
libtpu: 0.0.40
codegen_flags: <defaults>
</compile_context>

<pallas_src>
import math
import functools

import jax
import jax.numpy as jnp
from jax.experimental import pallas as pl
from jax.experimental.pallas import tpu as pltpu


# ----------------------------------------------------------------------------- #
# In-kernel helpers
# ----------------------------------------------------------------------------- #
def _gcn_propagate(adj, dinv, dinv2, v):
    """A_hat @ v with A_hat = D^-1/2 (A+I) D^-1/2, D = rowsum(A) + 1, computed as
    dinv*(A @ (dinv*v)) + dinv^2 * v so neither A+I nor A_hat ever materializes.
    The O(n^2) matmul uses bf16 MXU operands with f32 accumulation."""
    av = jnp.dot(adj.astype(jnp.bfloat16), (dinv * v).astype(jnp.bfloat16),
                 preferred_element_type=jnp.float32)
    return dinv * av + dinv2 * v


# ----------------------------------------------------------------------------- #
# Fused Pallas kernels (one graph per grid step)
# ----------------------------------------------------------------------------- #
def gcn_pool_sl_readout_kernel(adj_ref, x_ref, w_ref, b_ref, att_ref,
                               xk_ref, adjk_ref, read_ref,
                               *, k, lamb, neg_slope=0.2):
    """Per graph: GCNConv -> HGP-SL info score -> in-kernel top-k -> pool gather
    -> structure-learning attention -> [gmp || gap] readout."""
    n = adj_ref.shape[0]
    nh = w_ref.shape[1]

    adj = adj_ref[...]                                   # [n, n]
    x = x_ref[...]                                       # [n, F]

    # --- GCNConv: h = relu((A_hat @ x) @ W + b)  (A+I never materialized) ----
    deg = jnp.sum(adj, axis=1, keepdims=True) + 1.0      # degrees of A+I, [n,1]
    dinv = jax.lax.rsqrt(deg)                            # f32 (EUP)
    dinv2 = dinv * dinv
    ax = _gcn_propagate(adj, dinv, dinv2, x)
    h = jnp.maximum(
        jnp.dot(ax.astype(jnp.bfloat16), w_ref[...].astype(jnp.bfloat16),
                preferred_element_type=jnp.float32) + b_ref[...], 0.0)   # [n, H]

    # --- HGP-SL node information score (kept in f32) --------------------------
    ah = _gcn_propagate(adj, dinv, dinv2, h)
    score = jnp.sum(jnp.abs(h - ah), axis=1, keepdims=True)              # [n, 1]

    # --- in-kernel per-graph top-k: k argmax-and-mask steps -------------------
    # Builds the one-hot selection matrix P[i, j] = (perm[i] == j) directly, so
    # the score/perm never round-trips through HBM and no XLA top_k launch is
    # needed. Float iotas keep everything on well-trodden VPU/XLU paths.
    row_f = jax.lax.broadcasted_iota(jnp.int32, (n, 1), 0).astype(jnp.float32)
    col_f = jax.lax.broadcasted_iota(jnp.int32, (1, n), 1).astype(jnp.float32)
    s_work = score
    p_rows = []
    for _ in range(k):                                   # k is small and static
        mx = jnp.max(s_work, axis=0, keepdims=True)      # [1, 1]
        is_max = s_work >= mx
        idx = jnp.min(jnp.where(is_max, row_f, jnp.float32(n)),
                      axis=0, keepdims=True)             # leftmost argmax, [1,1]
        p_rows.append((col_f == idx).astype(jnp.float32))          # [1, n]
        s_work = jnp.where(row_f == idx, -1e30, s_work)
    p = jnp.concatenate(p_rows, axis=0)                  # one-hot P, [k, n]

    # --- pool: gather nodes / induced adjacency via one-hot matmuls -----------
    # (f32 operands so the gather stays exact; P is tiny per graph)
    xk = jnp.dot(p, h, preferred_element_type=jnp.float32)               # [k, H]
    pa = jnp.dot(p, adj, preferred_element_type=jnp.float32)             # [k, n]
    adj_k = jax.lax.dot_general(pa, p, (((1,), (1,)), ((), ())),
                                preferred_element_type=jnp.float32)      # [k, k]

    # --- structure learning: masked softmax (all nodes same graph) ------------
    att = att_ref[...]                                                   # [2, H]
    s_col = jax.lax.dot_general(xk, att[0:1, :], (((1,), (1,)), ((), ())),
                                preferred_element_type=jnp.float32)      # [k, 1]
    t_row = jax.lax.dot_general(att[1:2, :], xk, (((1,), (1,)), ((), ())),
                                preferred_element_type=jnp.float32)      # [1, k]
    logits = s_col + t_row
    logits = jnp.where(logits > 0, logits, neg_slope * logits)           # leaky relu
    logits = logits + jnp.float32(lamb) * adj_k
    mx = jnp.max(logits, axis=1, keepdims=True)
    e = jnp.exp(logits - mx)
    w_adj = e * pl.reciprocal(jnp.sum(e, axis=1, keepdims=True), approx=True)
    rid = jax.lax.broadcasted_iota(jnp.int32, (k, k), 0)
    cid = jax.lax.broadcasted_iota(jnp.int32, (k, k), 1)
    w_adj = jnp.where(rid == cid, 0.0, w_adj)            # drop self loops

    xk_ref[...] = xk
    adjk_ref[...] = w_adj

    # --- fused [gmp || gap] readout for this graph -----------------------------
    gmp = jnp.max(xk, axis=0, keepdims=True)                             # [1, H]
    gap = jnp.sum(xk, axis=0, keepdims=True) * jnp.float32(1.0 / k)      # [1, H]
    read_ref[...] = jnp.concatenate([gmp, gap], axis=1)                  # [1, 2H]


def gcn_head_kernel(adj_ref, x_ref, wc_ref, bc_ref, x1_ref, x2_ref,
                    w1_ref, b1_ref, w2_ref, b2_ref, w3_ref, b3_ref, o_ref):
    """Per graph: conv3 + readout3 + (relu(x1)+relu(x2)+relu(x3)) MLP head +
    log_softmax. The [gmp || gap] concat is avoided by splitting w_l1."""
    k = adj_ref.shape[0]
    nh = wc_ref.shape[1]

    adj = adj_ref[...]                                   # [k, k]
    x = x_ref[...]                                       # [k, H]
    deg = jnp.sum(adj, axis=1, keepdims=True) + 1.0
    dinv = jax.lax.rsqrt(deg)
    dinv2 = dinv * dinv
    ax = _gcn_propagate(adj, dinv, dinv2, x)
    xh = jnp.maximum(
        jnp.dot(ax.astype(jnp.bfloat16), wc_ref[...].astype(jnp.bfloat16),
                preferred_element_type=jnp.float32) + bc_ref[...], 0.0)  # [k, H]

    gmp = jnp.max(xh, axis=0, keepdims=True)                             # [1, H]
    gap = jnp.sum(xh, axis=0, keepdims=True) * jnp.float32(1.0 / k)      # [1, H]

    relu = lambda v: jnp.maximum(v, 0.0)
    x1 = x1_ref[...]                                                     # [1, 2H]
    x2 = x2_ref[...]                                                     # [1, 2H]
    # xc = relu(x1) + relu(x2) + relu([gmp||gap]), kept as two lane-dense halves.
    xc_top = relu(x1[:, 0:nh]) + relu(x2[:, 0:nh]) + relu(gmp)           # [1, H]
    xc_bot = relu(x1[:, nh:]) + relu(x2[:, nh:]) + relu(gap)             # [1, H]

    w1 = w1_ref[...]                                                     # [2H, H]
    hh = relu(jnp.dot(xc_top, w1[0:nh, :], preferred_element_type=jnp.float32)
              + jnp.dot(xc_bot, w1[nh:, :], preferred_element_type=jnp.float32)
              + b1_ref[...])
    # TODO(synk): dropout skipped (inference mode, training=False).
    hh = relu(jnp.dot(hh, w2_ref[...], preferred_element_type=jnp.float32)
              + b2_ref[...])
    z = jnp.dot(hh, w3_ref[...], preferred_element_type=jnp.float32) + b3_ref[...]
    z = z - jnp.max(z, axis=1, keepdims=True)
    o_ref[...] = z - jnp.log(jnp.sum(jnp.exp(z), axis=1, keepdims=True))


# ----------------------------------------------------------------------------- #
# pallas_call wrappers: grid=(G,), one graph per step, "parallel" semantics
# ----------------------------------------------------------------------------- #
_COMPILER_PARAMS = pltpu.CompilerParams(
    dimension_semantics=("parallel",),          # graphs shard across v7x's 2 TCs
    vmem_limit_bytes=32 * 1024 * 1024,          # lift v5e's 16 MiB scoped default
)


def gcn_pool_sl_readout(adj, x, w, b, att, k, lamb):
    g, n, _ = adj.shape
    f = x.shape[2]
    nh = w.shape[1]
    kernel = functools.partial(gcn_pool_sl_readout_kernel, k=k, lamb=lamb)
    return pl.pallas_call(
        kernel,
        grid=(g,),
        in_specs=[
            pl.BlockSpec((None, n, n), lambda i: (i, 0, 0)),     # adj (per graph)
            pl.BlockSpec((None, n, f), lambda i: (i, 0, 0)),     # x   (per graph)
            pl.BlockSpec((f, nh), lambda i: (0, 0)),             # W   (replicated)
            pl.BlockSpec((1, nh), lambda i: (0, 0)),             # b
            pl.BlockSpec((2, nh), lambda i: (0, 0)),             # att
        ],
        out_specs=(
            pl.BlockSpec((None, k, nh), lambda i: (i, 0, 0)),    # pooled x
            pl.BlockSpec((None, k, k), lambda i: (i, 0, 0)),     # learned adjacency
            pl.BlockSpec((None, 1, 2 * nh), lambda i: (i, 0, 0)),  # [gmp||gap]
        ),
        out_shape=(
            jax.ShapeDtypeStruct((g, k, nh), jnp.float32),
            jax.ShapeDtypeStruct((g, k, k), jnp.float32),
            jax.ShapeDtypeStruct((g, 1, 2 * nh), jnp.float32),
        ),
        compiler_params=_COMPILER_PARAMS,
    )(adj, x, w, b, att)


def gcn_head(adj, x, x1, x2, p):
    g, k, _ = adj.shape
    nh = p["w_c3"].shape[1]
    c = p["w_l3"].shape[1]
    return pl.pallas_call(
        gcn_head_kernel,
        grid=(g,),
        in_specs=[
            pl.BlockSpec((None, k, k), lambda i: (i, 0, 0)),     # adj
            pl.BlockSpec((None, k, nh), lambda i: (i, 0, 0)),    # x
            pl.BlockSpec((nh, nh), lambda i: (0, 0)),            # w_c3
            pl.BlockSpec((1, nh), lambda i: (0, 0)),             # b_c3
            pl.BlockSpec((None, 1, 2 * nh), lambda i: (i, 0, 0)),  # x1 readout
            pl.BlockSpec((None, 1, 2 * nh), lambda i: (i, 0, 0)),  # x2 readout
            pl.BlockSpec((2 * nh, nh), lambda i: (0, 0)),        # w_l1
            pl.BlockSpec((1, nh), lambda i: (0, 0)),             # b_l1
            pl.BlockSpec((nh, nh // 2), lambda i: (0, 0)),       # w_l2
            pl.BlockSpec((1, nh // 2), lambda i: (0, 0)),        # b_l2
            pl.BlockSpec((nh // 2, c), lambda i: (0, 0)),        # w_l3
            pl.BlockSpec((1, c), lambda i: (0, 0)),              # b_l3
        ],
        out_specs=pl.BlockSpec((None, 1, c), lambda i: (i, 0, 0)),
        out_shape=jax.ShapeDtypeStruct((g, 1, c), jnp.float32),
        compiler_params=_COMPILER_PARAMS,
    )(adj, x, p["w_c3"], p["b_c3"], x1, x2,
      p["w_l1"], p["b_l1"], p["w_l2"], p["b_l2"], p["w_l3"], p["b_l3"])


# ----------------------------------------------------------------------------- #
# Full model forward (graphs are contiguous equal-sized blocks, block-diag adj)
# ----------------------------------------------------------------------------- #
def model_forward(params, x, adj, batch, n_graphs, pooling_ratio=0.5, lamb=1.0):
    del batch  # graph membership is implied by contiguous equal-sized blocks
    n, f = x.shape
    n_per = n // n_graphs

    # Exploit the block-diagonal batch structure: extract per-graph blocks once.
    xg = x.reshape(n_graphs, n_per, f)
    gidx = jnp.arange(n_graphs)
    adjg = adj.reshape(n_graphs, n_per, n_graphs, n_per)[gidx, :, gidx, :]

    k1 = int(math.ceil(pooling_ratio * n_per))
    k2 = int(math.ceil(pooling_ratio * k1))

    # conv1 + pool1 (info score + in-kernel top-k + structure learning) + readout1
    xk, adjk, r1 = gcn_pool_sl_readout(adjg, xg, params["w_c1"], params["b_c1"],
                                       params["att1"], k1, lamb)
    # conv2 + pool2 + readout2
    xk, adjk, r2 = gcn_pool_sl_readout(adjk, xk, params["w_c2"], params["b_c2"],
                                       params["att2"], k2, lamb)
    # conv3 + readout3 + MLP head + log_softmax
    out = gcn_head(adjk, xk, r1, r2, params)
    return out.reshape(n_graphs, -1)


# ----------------------------------------------------------------------------- #
# Deterministic setup and run
# ----------------------------------------------------------------------------- #
def _glorot(key, shape):
    fan_in, fan_out = shape[0], shape[1]
    lim = math.sqrt(6.0 / (fan_in + fan_out))
    return jax.random.uniform(key, shape, jnp.float32, -lim, lim)


def make_params(key, num_features, nhid, num_classes):
    ks = jax.random.split(key, 12)
    return {
        "w_c1": _glorot(ks[0], (num_features, nhid)), "b_c1": jnp.zeros((1, nhid), jnp.float32),
        "w_c2": _glorot(ks[1], (nhid, nhid)),         "b_c2": jnp.zeros((1, nhid), jnp.float32),
        "w_c3": _glorot(ks[2], (nhid, nhid)),         "b_c3": jnp.zeros((1, nhid), jnp.float32),
        "att1": _glorot(ks[3], (2, nhid)),
        "att2": _glorot(ks[4], (2, nhid)),
        "w_l1": _glorot(ks[5], (2 * nhid, nhid)),     "b_l1": jnp.zeros((1, nhid), jnp.float32),
        "w_l2": _glorot(ks[6], (nhid, nhid // 2)),    "b_l2": jnp.zeros((1, nhid // 2), jnp.float32),
        "w_l3": _glorot(ks[7], (nhid // 2, num_classes)),
        "b_l3": jnp.zeros((1, num_classes), jnp.float32),
    }


def ring_adj(n):
    idx = jnp.arange(n)
    a = jnp.zeros((n, n), jnp.float32)
    a = a.at[idx, (idx + 1) % n].set(1.0)
    a = a.at[(idx + 1) % n, idx].set(1.0)
    return a


if __name__ == "__main__":
    # small shapes: 2 graphs x 16 nodes, num_features=16, nhid=32, num_classes=4
    num_features, nhid, num_classes = 16, 32, 4
    n_graphs, n_per = 2, 16
    n_nodes = n_graphs * n_per

    key = jax.random.PRNGKey(0)
    k_x, k_p = jax.random.split(key)

    x = jax.random.normal(k_x, (n_nodes, num_features), jnp.float32)
    adj = jax.scipy.linalg.block_diag(*[ring_adj(n_per) for _ in range(n_graphs)])
    adj = adj.astype(jnp.float32)
    batch = jnp.repeat(jnp.arange(n_graphs, dtype=jnp.int32), n_per)

    params = make_params(k_p, num_features, nhid, num_classes)

    out = model_forward(params, x, adj, batch, n_graphs,
                        pooling_ratio=0.5, lamb=1.0)
    out = jax.block_until_ready(out)

    assert out.shape == (n_graphs, num_classes)
    assert bool(jnp.all(jnp.isfinite(out)))
    # rows of log_softmax should exp-sum to ~1
    assert bool(jnp.allclose(jnp.sum(jnp.exp(out), axis=-1), 1.0, atol=1e-4))
    print("KERNEL_OK")
</pallas_src>

<mosaic_0001>
module attributes {stable_mosaic.version = 11 : i64} {
  func.func @gcn_pool_sl_readout_kernel(%arg0: i32, %arg1: memref<1x16x16xf32, #tpu.memory_space<vmem>>, %arg2: memref<1x16x16xf32, #tpu.memory_space<vmem>>, %arg3: memref<16x32xf32, #tpu.memory_space<vmem>>, %arg4: memref<1x32xf32, #tpu.memory_space<vmem>>, %arg5: memref<2x32xf32, #tpu.memory_space<vmem>>, %arg6: memref<1x8x32xf32, #tpu.memory_space<vmem>>, %arg7: memref<1x8x8xf32, #tpu.memory_space<vmem>>, %arg8: memref<1x1x64xf32, #tpu.memory_space<vmem>>) attributes {dimension_semantics = [#tpu.dimension_semantics<parallel>], iteration_bounds = array<i64: 2>, scalar_prefetch = 0 : i64, scratch_operands = 0 : i64, tpu.core_type = #tpu.core_type<tc>, window_params = [{transform_indices = @transform_0, window_bounds = array<i64: 1, 16, 16>}, {transform_indices = @transform_1, window_bounds = array<i64: 1, 16, 16>}, {pipeline_mode = #tpu.pipeline_mode<synchronous>, transform_indices = @transform_2, window_bounds = array<i64: 16, 32>}, {pipeline_mode = #tpu.pipeline_mode<synchronous>, transform_indices = @transform_3, window_bounds = array<i64: 1, 32>}, {pipeline_mode = #tpu.pipeline_mode<synchronous>, transform_indices = @transform_4, window_bounds = array<i64: 2, 32>}, {transform_indices = @transform_5, window_bounds = array<i64: 1, 8, 32>}, {transform_indices = @transform_6, window_bounds = array<i64: 1, 8, 8>}, {transform_indices = @transform_7, window_bounds = array<i64: 1, 1, 64>}]} {
    %c0 = arith.constant 0 : index
    %c0_0 = arith.constant 0 : index
    %c0_1 = arith.constant 0 : index
    %0 = vector.load %arg1[%c0, %c0_0, %c0_1] : memref<1x16x16xf32, #tpu.memory_space<vmem>>, vector<1x16x16xf32>
    %1 = vector.shape_cast %0 : vector<1x16x16xf32> to vector<16x16xf32>
    %c0_2 = arith.constant 0 : index
    %c0_3 = arith.constant 0 : index
    %c0_4 = arith.constant 0 : index
    %2 = vector.load %arg2[%c0_2, %c0_3, %c0_4] : memref<1x16x16xf32, #tpu.memory_space<vmem>>, vector<1x16x16xf32>
    %3 = vector.shape_cast %2 : vector<1x16x16xf32> to vector<16x16xf32>
    %cst = arith.constant dense<0.000000e+00> : vector<16xf32>
    %4 = vector.multi_reduction <add>, %1, %cst [1] : vector<16x16xf32> to vector<16xf32>
    %5 = vector.shape_cast %4 : vector<16xf32> to vector<16x1xf32>
    %cst_5 = arith.constant 1.000000e+00 : f32
    %6 = vector.broadcast %cst_5 : f32 to vector<16x1xf32>
    %7 = arith.addf %5, %6 : vector<16x1xf32>
    %8 = math.rsqrt %7 : vector<16x1xf32>
    %9 = arith.mulf %8, %8 : vector<16x1xf32>
    %10 = arith.truncf %1 : vector<16x16xf32> to vector<16x16xbf16>
    %11 = vector.broadcast %8 : vector<16x1xf32> to vector<16x16xf32>
    %12 = arith.mulf %11, %3 : vector<16x16xf32>
    %13 = arith.truncf %12 : vector<16x16xf32> to vector<16x16xbf16>
    %cst_6 = arith.constant dense<0.000000e+00> : vector<16x16xf32>
    %14 = tpu.matmul %10, %13, %cst_6 {dimension_numbers = #tpu.dot_dimension_numbers<[1], [0], [0], [1], [0, 0, 1, 1], [], []>} : vector<16x16xbf16>, vector<16x16xbf16>, vector<16x16xf32> -> vector<16x16xf32>
    %15 = vector.broadcast %8 : vector<16x1xf32> to vector<16x16xf32>
    %16 = arith.mulf %15, %14 : vector<16x16xf32>
    %17 = vector.broadcast %9 : vector<16x1xf32> to vector<16x16xf32>
    %18 = arith.mulf %17, %3 : vector<16x16xf32>
    %19 = arith.addf %16, %18 : vector<16x16xf32>
    %20 = arith.truncf %19 : vector<16x16xf32> to vector<16x16xbf16>
    %c0_7 = arith.constant 0 : index
    %c0_8 = arith.constant 0 : index
    %21 = vector.load %arg3[%c0_7, %c0_8] : memref<16x32xf32, #tpu.memory_space<vmem>>, vector<16x32xf32>
    %22 = arith.truncf %21 : vector<16x32xf32> to vector<16x32xbf16>
    %cst_9 = arith.constant dense<0.000000e+00> : vector<16x32xf32>
    %23 = tpu.matmul %20, %22, %cst_9 {dimension_numbers = #tpu.dot_dimension_numbers<[1], [0], [0], [1], [0, 0, 1, 1], [], []>} : vector<16x16xbf16>, vector<16x32xbf16>, vector<16x32xf32> -> vector<16x32xf32>
    %c0_10 = arith.constant 0 : index
    %c0_11 = arith.constant 0 : index
    %24 = vector.load %arg4[%c0_10, %c0_11] : memref<1x32xf32, #tpu.memory_space<vmem>>, vector<1x32xf32>
    %25 = vector.broadcast %24 : vector<1x32xf32> to vector<16x32xf32>
    %26 = arith.addf %23, %25 : vector<16x32xf32>
    %cst_12 = arith.constant 0.000000e+00 : f32
    %27 = vector.broadcast %cst_12 : f32 to vector<16x32xf32>
    %28 = arith.maximumf %26, %27 : vector<16x32xf32>
    %29 = arith.truncf %1 : vector<16x16xf32> to vector<16x16xbf16>
    %30 = vector.broadcast %8 : vector<16x1xf32> to vector<16x32xf32>
    %31 = arith.mulf %30, %28 : vector<16x32xf32>
    %32 = arith.truncf %31 : vector<16x32xf32> to vector<16x32xbf16>
    %cst_13 = arith.constant dense<0.000000e+00> : vector<16x32xf32>
    %33 = tpu.matmul %29, %32, %cst_13 {dimension_numbers = #tpu.dot_dimension_numbers<[1], [0], [0], [1], [0, 0, 1, 1], [], []>} : vector<16x16xbf16>, vector<16x32xbf16>, vector<16x32xf32> -> vector<16x32xf32>
    %34 = vector.broadcast %8 : vector<16x1xf32> to vector<16x32xf32>
    %35 = arith.mulf %34, %33 : vector<16x32xf32>
    %36 = vector.broadcast %9 : vector<16x1xf32> to vector<16x32xf32>
    %37 = arith.mulf %36, %28 : vector<16x32xf32>
    %38 = arith.addf %35, %37 : vector<16x32xf32>
    %39 = arith.subf %28, %38 : vector<16x32xf32>
    %40 = math.absf %39 : vector<16x32xf32>
    %cst_14 = arith.constant dense<0.000000e+00> : vector<16xf32>
    %41 = vector.multi_reduction <add>, %40, %cst_14 [1] : vector<16x32xf32> to vector<16xf32>
    %42 = vector.shape_cast %41 : vector<16xf32> to vector<16x1xf32>
    %43 = tpu.iota {dimensions = array<i32: 0>} : vector<16x1xi32>
    %44 = arith.sitofp %43 : vector<16x1xi32> to vector<16x1xf32>
    %45 = tpu.iota {dimensions = array<i32: 1>} : vector<1x16xi32>
    %46 = arith.sitofp %45 : vector<1x16xi32> to vector<1x16xf32>
    %cst_15 = arith.constant dense<0xFF800000> : vector<1xf32>
    %47 = vector.multi_reduction <maximumf>, %42, %cst_15 [0] : vector<16x1xf32> to vector<1xf32>
    %48 = vector.shape_cast %47 : vector<1xf32> to vector<1x1xf32>
    %49 = vector.broadcast %48 : vector<1x1xf32> to vector<16x1xf32>
    %50 = arith.cmpf oge, %42, %49 : vector<16x1xf32>
    %cst_16 = arith.constant 1.600000e+01 : f32
    %51 = vector.broadcast %cst_16 : f32 to vector<16x1xf32>
    %52 = arith.select %50, %44, %51 : vector<16x1xi1>, vector<16x1xf32>
    %cst_17 = arith.constant dense<0x7F800000> : vector<1xf32>
    %53 = vector.multi_reduction <minimumf>, %52, %cst_17 [0] : vector<16x1xf32> to vector<1xf32>
    %54 = vector.shape_cast %53 : vector<1xf32> to vector<1x1xf32>
    %55 = vector.broadcast %54 : vector<1x1xf32> to vector<1x16xf32>
    %56 = arith.cmpf oeq, %46, %55 : vector<1x16xf32>
    %57 = arith.extui %56 : vector<1x16xi1> to vector<1x16xi32>
    %58 = arith.sitofp %57 : vector<1x16xi32> to vector<1x16xf32>
    %59 = vector.broadcast %54 : vector<1x1xf32> to vector<16x1xf32>
    %60 = arith.cmpf oeq, %44, %59 : vector<16x1xf32>
    %cst_18 = arith.constant -1.000000e+30 : f32
    %61 = vector.broadcast %cst_18 : f32 to vector<16x1xf32>
    %62 = arith.select %60, %61, %42 : vector<16x1xi1>, vector<16x1xf32>
    %cst_19 = arith.constant dense<0xFF800000> : vector<1xf32>
    %63 = vector.multi_reduction <maximumf>, %62, %cst_19 [0] : vector<16x1xf32> to vector<1xf32>
    %64 = vector.shape_cast %63 : vector<1xf32> to vector<1x1xf32>
    %65 = vector.broadcast %64 : vector<1x1xf32> to vector<16x1xf32>
    %66 = arith.cmpf oge, %62, %65 : vector<16x1xf32>
    %cst_20 = arith.constant 1.600000e+01 : f32
    %67 = vector.broadcast %cst_20 : f32 to vector<16x1xf32>
    %68 = arith.select %66, %44, %67 : vector<16x1xi1>, vector<16x1xf32>
    %cst_21 = arith.constant dense<0x7F800000> : vector<1xf32>
    %69 = vector.multi_reduction <minimumf>, %68, %cst_21 [0] : vector<16x1xf32> to vector<1xf32>
    %70 = vector.shape_cast %69 : vector<1xf32> to vector<1x1xf32>
    %71 = vector.broadcast %70 : vector<1x1xf32> to vector<1x16xf32>
    %72 = arith.cmpf oeq, %46, %71 : vector<1x16xf32>
    %73 = arith.extui %72 : vector<1x16xi1> to vector<1x16xi32>
    %74 = arith.sitofp %73 : vector<1x16xi32> to vector<1x16xf32>
    %75 = vector.broadcast %70 : vector<1x1xf32> to vector<16x1xf32>
    %76 = arith.cmpf oeq, %44, %75 : vector<16x1xf32>
    %cst_22 = arith.constant -1.000000e+30 : f32
    %77 = vector.broadcast %cst_22 : f32 to vector<16x1xf32>
    %78 = arith.select %76, %77, %62 : vector<16x1xi1>, vector<16x1xf32>
    %cst_23 = arith.constant dense<0xFF800000> : vector<1xf32>
    %79 = vector.multi_reduction <maximumf>, %78, %cst_23 [0] : vector<16x1xf32> to vector<1xf32>
    %80 = vector.shape_cast %79 : vector<1xf32> to vector<1x1xf32>
    %81 = vector.broadcast %80 : vector<1x1xf32> to vector<16x1xf32>
    %82 = arith.cmpf oge, %78, %81 : vector<16x1xf32>
    %cst_24 = arith.constant 1.600000e+01 : f32
    %83 = vector.broadcast %cst_24 : f32 to vector<16x1xf32>
    %84 = arith.select %82, %44, %83 : vector<16x1xi1>, vector<16x1xf32>
    %cst_25 = arith.constant dense<0x7F800000> : vector<1xf32>
    %85 = vector.multi_reduction <minimumf>, %84, %cst_25 [0] : vector<16x1xf32> to vector<1xf32>
    %86 = vector.shape_cast %85 : vector<1xf32> to vector<1x1xf32>
    %87 = vector.broadcast %86 : vector<1x1xf32> to vector<1x16xf32>
    %88 = arith.cmpf oeq, %46, %87 : vector<1x16xf32>
    %89 = arith.extui %88 : vector<1x16xi1> to vector<1x16xi32>
    %90 = arith.sitofp %89 : vector<1x16xi32> to vector<1x16xf32>
    %91 = vector.broadcast %86 : vector<1x1xf32> to vector<16x1xf32>
    %92 = arith.cmpf oeq, %44, %91 : vector<16x1xf32>
    %cst_26 = arith.constant -1.000000e+30 : f32
    %93 = vector.broadcast %cst_26 : f32 to vector<16x1xf32>
    %94 = arith.select %92, %93, %78 : vector<16x1xi1>, vector<16x1xf32>
    %cst_27 = arith.constant dense<0xFF800000> : vector<1xf32>
    %95 = vector.multi_reduction <maximumf>, %94, %cst_27 [0] : vector<16x1xf32> to vector<1xf32>
    %96 = vector.shape_cast %95 : vector<1xf32> to vector<1x1xf32>
    %97 = vector.broadcast %96 : vector<1x1xf32> to vector<16x1xf32>
    %98 = arith.cmpf oge, %94, %97 : vector<16x1xf32>
    %cst_28 = arith.constant 1.600000e+01 : f32
    %99 = vector.broadcast %cst_28 : f32 to vector<16x1xf32>
    %100 = arith.select %98, %44, %99 : vector<16x1xi1>, vector<16x1xf32>
    %cst_29 = arith.constant dense<0x7F800000> : vector<1xf32>
    %101 = vector.multi_reduction <minimumf>, %100, %cst_29 [0] : vector<16x1xf32> to vector<1xf32>
    %102 = vector.shape_cast %101 : vector<1xf32> to vector<1x1xf32>
    %103 = vector.broadcast %102 : vector<1x1xf32> to vector<1x16xf32>
    %104 = arith.cmpf oeq, %46, %103 : vector<1x16xf32>
    %105 = arith.extui %104 : vector<1x16xi1> to vector<1x16xi32>
    %106 = arith.sitofp %105 : vector<1x16xi32> to vector<1x16xf32>
    %107 = vector.broadcast %102 : vector<1x1xf32> to vector<16x1xf32>
    %108 = arith.cmpf oeq, %44, %107 : vector<16x1xf32>
    %cst_30 = arith.constant -1.000000e+30 : f32
    %109 = vector.broadcast %cst_30 : f32 to vector<16x1xf32>
    %110 = arith.select %108, %109, %94 : vector<16x1xi1>, vector<16x1xf32>
    %cst_31 = arith.constant dense<0xFF800000> : vector<1xf32>
    %111 = vector.multi_reduction <maximumf>, %110, %cst_31 [0] : vector<16x1xf32> to vector<1xf32>
    %112 = vector.shape_cast %111 : vector<1xf32> to vector<1x1xf32>
    %113 = vector.broadcast %112 : vector<1x1xf32> to vector<16x1xf32>
    %114 = arith.cmpf oge, %110, %113 : vector<16x1xf32>
    %cst_32 = arith.constant 1.600000e+01 : f32
    %115 = vector.broadcast %cst_32 : f32 to vector<16x1xf32>
    %116 = arith.select %114, %44, %115 : vector<16x1xi1>, vector<16x1xf32>
    %cst_33 = arith.constant dense<0x7F800000> : vector<1xf32>
    %117 = vector.multi_reduction <minimumf>, %116, %cst_33 [0] : vector<16x1xf32> to vector<1xf32>
    %118 = vector.shape_cast %117 : vector<1xf32> to vector<1x1xf32>
    %119 = vector.broadcast %118 : vector<1x1xf32> to vector<1x16xf32>
    %120 = arith.cmpf oeq, %46, %119 : vector<1x16xf32>
    %121 = arith.extui %120 : vector<1x16xi1> to vector<1x16xi32>
    %122 = arith.sitofp %121 : vector<1x16xi32> to vector<1x16xf32>
    %123 = vector.broadcast %118 : vector<1x1xf32> to vector<16x1xf32>
    %124 = arith.cmpf oeq, %44, %123 : vector<16x1xf32>
    %cst_34 = arith.constant -1.000000e+30 : f32
    %125 = vector.broadcast %cst_34 : f32 to vector<16x1xf32>
    %126 = arith.select %124, %125, %110 : vector<16x1xi1>, vector<16x1xf32>
    %cst_35 = arith.constant dense<0xFF800000> : vector<1xf32>
    %127 = vector.multi_reduction <maximumf>, %126, %cst_35 [0] : vector<16x1xf32> to vector<1xf32>
    %128 = vector.shape_cast %127 : vector<1xf32> to vector<1x1xf32>
    %129 = vector.broadcast %128 : vector<1x1xf32> to vector<16x1xf32>
    %130 = arith.cmpf oge, %126, %129 : vector<16x1xf32>
    %cst_36 = arith.constant 1.600000e+01 : f32
    %131 = vector.broadcast %cst_36 : f32 to vector<16x1xf32>
    %132 = arith.select %130, %44, %131 : vector<16x1xi1>, vector<16x1xf32>
    %cst_37 = arith.constant dense<0x7F800000> : vector<1xf32>
    %133 = vector.multi_reduction <minimumf>, %132, %cst_37 [0] : vector<16x1xf32> to vector<1xf32>
    %134 = vector.shape_cast %133 : vector<1xf32> to vector<1x1xf32>
    %135 = vector.broadcast %134 : vector<1x1xf32> to vector<1x16xf32>
    %136 = arith.cmpf oeq, %46, %135 : vector<1x16xf32>
    %137 = arith.extui %136 : vector<1x16xi1> to vector<1x16xi32>
    %138 = arith.sitofp %137 : vector<1x16xi32> to vector<1x16xf32>
    %139 = vector.broadcast %134 : vector<1x1xf32> to vector<16x1xf32>
    %140 = arith.cmpf oeq, %44, %139 : vector<16x1xf32>
    %cst_38 = arith.constant -1.000000e+30 : f32
    %141 = vector.broadcast %cst_38 : f32 to vector<16x1xf32>
    %142 = arith.select %140, %141, %126 : vector<16x1xi1>, vector<16x1xf32>
    %cst_39 = arith.constant dense<0xFF800000> : vector<1xf32>
    %143 = vector.multi_reduction <maximumf>, %142, %cst_39 [0] : vector<16x1xf32> to vector<1xf32>
    %144 = vector.shape_cast %143 : vector<1xf32> to vector<1x1xf32>
    %145 = vector.broadcast %144 : vector<1x1xf32> to vector<16x1xf32>
    %146 = arith.cmpf oge, %142, %145 : vector<16x1xf32>
    %cst_40 = arith.constant 1.600000e+01 : f32
    %147 = vector.broadcast %cst_40 : f32 to vector<16x1xf32>
    %148 = arith.select %146, %44, %147 : vector<16x1xi1>, vector<16x1xf32>
    %cst_41 = arith.constant dense<0x7F800000> : vector<1xf32>
    %149 = vector.multi_reduction <minimumf>, %148, %cst_41 [0] : vector<16x1xf32> to vector<1xf32>
    %150 = vector.shape_cast %149 : vector<1xf32> to vector<1x1xf32>
    %151 = vector.broadcast %150 : vector<1x1xf32> to vector<1x16xf32>
    %152 = arith.cmpf oeq, %46, %151 : vector<1x16xf32>
    %153 = arith.extui %152 : vector<1x16xi1> to vector<1x16xi32>
    %154 = arith.sitofp %153 : vector<1x16xi32> to vector<1x16xf32>
    %155 = vector.broadcast %150 : vector<1x1xf32> to vector<16x1xf32>
    %156 = arith.cmpf oeq, %44, %155 : vector<16x1xf32>
    %cst_42 = arith.constant -1.000000e+30 : f32
    %157 = vector.broadcast %cst_42 : f32 to vector<16x1xf32>
    %158 = arith.select %156, %157, %142 : vector<16x1xi1>, vector<16x1xf32>
    %cst_43 = arith.constant dense<0xFF800000> : vector<1xf32>
    %159 = vector.multi_reduction <maximumf>, %158, %cst_43 [0] : vector<16x1xf32> to vector<1xf32>
    %160 = vector.shape_cast %159 : vector<1xf32> to vector<1x1xf32>
    %161 = vector.broadcast %160 : vector<1x1xf32> to vector<16x1xf32>
    %162 = arith.cmpf oge, %158, %161 : vector<16x1xf32>
    %cst_44 = arith.constant 1.600000e+01 : f32
    %163 = vector.broadcast %cst_44 : f32 to vector<16x1xf32>
    %164 = arith.select %162, %44, %163 : vector<16x1xi1>, vector<16x1xf32>
    %cst_45 = arith.constant dense<0x7F800000> : vector<1xf32>
    %165 = vector.multi_reduction <minimumf>, %164, %cst_45 [0] : vector<16x1xf32> to vector<1xf32>
    %166 = vector.shape_cast %165 : vector<1xf32> to vector<1x1xf32>
    %167 = vector.broadcast %166 : vector<1x1xf32> to vector<1x16xf32>
    %168 = arith.cmpf oeq, %46, %167 : vector<1x16xf32>
    %169 = arith.extui %168 : vector<1x16xi1> to vector<1x16xi32>
    %170 = arith.sitofp %169 : vector<1x16xi32> to vector<1x16xf32>
    %171 = tpu.concatenate %58, %74, %90, %106, %122, %138, %154, %170 in 0 : vector<1x16xf32>, vector<1x16xf32>, vector<1x16xf32>, vector<1x16xf32>, vector<1x16xf32>, vector<1x16xf32>, vector<1x16xf32>, vector<1x16xf32> -> vector<8x16xf32>
    %cst_46 = arith.constant dense<0.000000e+00> : vector<8x32xf32>
    %172 = tpu.matmul %171, %28, %cst_46 {dimension_numbers = #tpu.dot_dimension_numbers<[1], [0], [0], [1], [0, 0, 1, 1], [], []>} : vector<8x16xf32>, vector<16x32xf32>, vector<8x32xf32> -> vector<8x32xf32>
    %cst_47 = arith.constant dense<0.000000e+00> : vector<8x16xf32>
    %173 = tpu.matmul %171, %1, %cst_47 {dimension_numbers = #tpu.dot_dimension_numbers<[1], [0], [0], [1], [0, 0, 1, 1], [], []>} : vector<8x16xf32>, vector<16x16xf32>, vector<8x16xf32> -> vector<8x16xf32>
    %cst_48 = arith.constant dense<0.000000e+00> : vector<8x8xf32>
    %174 = tpu.matmul %173, %171, %cst_48 {dimension_numbers = #tpu.dot_dimension_numbers<[1], [1], [0], [0], [0, 0, 1, 0], [], []>} : vector<8x16xf32>, vector<8x16xf32>, vector<8x8xf32> -> vector<8x8xf32>
    %c0_49 = arith.constant 0 : index
    %c0_50 = arith.constant 0 : index
    %175 = vector.load %arg5[%c0_49, %c0_50] : memref<2x32xf32, #tpu.memory_space<vmem>>, vector<2x32xf32>
    %176 = vector.extract_strided_slice %175 {offsets = [0, 0], sizes = [1, 32], strides = [1, 1]} : vector<2x32xf32> to vector<1x32xf32>
    %cst_51 = arith.constant dense<0.000000e+00> : vector<8x1xf32>
    %177 = tpu.matmul %172, %176, %cst_51 {dimension_numbers = #tpu.dot_dimension_numbers<[1], [1], [0], [0], [0, 0, 1, 0], [], []>} : vector<8x32xf32>, vector<1x32xf32>, vector<8x1xf32> -> vector<8x1xf32>
    %178 = vector.extract_strided_slice %175 {offsets = [1, 0], sizes = [1, 32], strides = [1, 1]} : vector<2x32xf32> to vector<1x32xf32>
    %cst_52 = arith.constant dense<0.000000e+00> : vector<1x8xf32>
    %179 = tpu.matmul %178, %172, %cst_52 {dimension_numbers = #tpu.dot_dimension_numbers<[1], [1], [0], [0], [0, 0, 1, 0], [], []>} : vector<1x32xf32>, vector<8x32xf32>, vector<1x8xf32> -> vector<1x8xf32>
    %180 = vector.broadcast %177 : vector<8x1xf32> to vector<8x8xf32>
    %181 = vector.broadcast %179 : vector<1x8xf32> to vector<8x8xf32>
    %182 = arith.addf %180, %181 : vector<8x8xf32>
    %cst_53 = arith.constant 0.000000e+00 : f32
    %183 = vector.broadcast %cst_53 : f32 to vector<8x8xf32>
    %184 = arith.cmpf ogt, %182, %183 : vector<8x8xf32>
    %cst_54 = arith.constant 2.000000e-01 : f32
    %185 = vector.broadcast %cst_54 : f32 to vector<8x8xf32>
    %186 = arith.mulf %185, %182 : vector<8x8xf32>
    %187 = arith.select %184, %182, %186 : vector<8x8xi1>, vector<8x8xf32>
    %cst_55 = arith.constant 1.000000e+00 : f32
    %188 = vector.broadcast %cst_55 : f32 to vector<8x8xf32>
    %189 = arith.mulf %188, %174 : vector<8x8xf32>
    %190 = arith.addf %187, %189 : vector<8x8xf32>
    %cst_56 = arith.constant dense<0xFF800000> : vector<8xf32>
    %191 = vector.multi_reduction <maximumf>, %190, %cst_56 [1] : vector<8x8xf32> to vector<8xf32>
    %192 = vector.shape_cast %191 : vector<8xf32> to vector<8x1xf32>
    %193 = vector.broadcast %192 : vector<8x1xf32> to vector<8x8xf32>
    %194 = arith.subf %190, %193 : vector<8x8xf32>
    %195 = math.exp %194 : vector<8x8xf32>
    %cst_57 = arith.constant dense<0.000000e+00> : vector<8xf32>
    %196 = vector.multi_reduction <add>, %195, %cst_57 [1] : vector<8x8xf32> to vector<8xf32>
    %197 = vector.shape_cast %196 : vector<8xf32> to vector<8x1xf32>
    %198 = tpu.reciprocal %197 {approx = true} : vector<8x1xf32> -> vector<8x1xf32>
    %199 = vector.broadcast %198 : vector<8x1xf32> to vector<8x8xf32>
    %200 = arith.mulf %195, %199 : vector<8x8xf32>
    %201 = tpu.iota {dimensions = array<i32: 0>} : vector<8x8xi32>
    %202 = tpu.iota {dimensions = array<i32: 1>} : vector<8x8xi32>
    %203 = arith.cmpi eq, %201, %202 : vector<8x8xi32>
    %cst_58 = arith.constant 0.000000e+00 : f32
    %204 = vector.broadcast %cst_58 : f32 to vector<8x8xf32>
    %205 = arith.select %203, %204, %200 : vector<8x8xi1>, vector<8x8xf32>
    %c0_59 = arith.constant 0 : index
    %c0_60 = arith.constant 0 : index
    %c0_61 = arith.constant 0 : index
    %206 = vector.load %arg6[%c0_59, %c0_60, %c0_61] : memref<1x8x32xf32, #tpu.memory_space<vmem>>, vector<1x8x32xf32>
    %207 = vector.shape_cast %206 : vector<1x8x32xf32> to vector<8x32xf32>
    %208 = vector.shape_cast %172 : vector<8x32xf32> to vector<1x8x32xf32>
    tpu.vector_store %arg6[%c0_59, %c0_60, %c0_61], %208 {strides = array<i32>} : memref<1x8x32xf32, #tpu.memory_space<vmem>>, vector<1x8x32xf32>,
    %c0_62 = arith.constant 0 : index
    %c0_63 = arith.constant 0 : index
    %c0_64 = arith.constant 0 : index
    %209 = vector.load %arg7[%c0_62, %c0_63, %c0_64] : memref<1x8x8xf32, #tpu.memory_space<vmem>>, vector<1x8x8xf32>
    %210 = vector.shape_cast %209 : vector<1x8x8xf32> to vector<8x8xf32>
    %211 = vector.shape_cast %205 : vector<8x8xf32> to vector<1x8x8xf32>
    tpu.vector_store %arg7[%c0_62, %c0_63, %c0_64], %211 {strides = array<i32>} : memref<1x8x8xf32, #tpu.memory_space<vmem>>, vector<1x8x8xf32>,
    %cst_65 = arith.constant dense<0xFF800000> : vector<32xf32>
    %212 = vector.multi_reduction <maximumf>, %172, %cst_65 [0] : vector<8x32xf32> to vector<32xf32>
    %213 = vector.shape_cast %212 : vector<32xf32> to vector<1x32xf32>
    %cst_66 = arith.constant dense<0.000000e+00> : vector<32xf32>
    %214 = vector.multi_reduction <add>, %172, %cst_66 [0] : vector<8x32xf32> to vector<32xf32>
    %215 = vector.shape_cast %214 : vector<32xf32> to vector<1x32xf32>
    %cst_67 = arith.constant 1.250000e-01 : f32
    %216 = vector.broadcast %cst_67 : f32 to vector<1x32xf32>
    %217 = arith.mulf %215, %216 : vector<1x32xf32>
    %218 = tpu.concatenate %213, %217 in 1 : vector<1x32xf32>, vector<1x32xf32> -> vector<1x64xf32>
    %c0_68 = arith.constant 0 : index
    %c0_69 = arith.constant 0 : index
    %c0_70 = arith.constant 0 : index
    %219 = vector.load %arg8[%c0_68, %c0_69, %c0_70] : memref<1x1x64xf32, #tpu.memory_space<vmem>>, vector<1x1x64xf32>
    %220 = vector.shape_cast %219 : vector<1x1x64xf32> to vector<1x64xf32>
    %221 = vector.shape_cast %218 : vector<1x64xf32> to vector<1x1x64xf32>
    tpu.vector_store %arg8[%c0_68, %c0_69, %c0_70], %221 {strides = array<i32>} : memref<1x1x64xf32, #tpu.memory_space<vmem>>, vector<1x1x64xf32>,
    return
  }
  func.func @transform_0(%arg0: i32) -> (i32, i32, i32) {
    %c0_i32 = arith.constant 0 : i32
    %c0_i32_0 = arith.constant 0 : i32
    %c0_i32_1 = arith.constant 0 : i32
    return %arg0, %c0_i32, %c0_i32_0 : i32, i32, i32
  }
  func.func @transform_1(%arg0: i32) -> (i32, i32, i32) {
    %c0_i32 = arith.constant 0 : i32
    %c0_i32_0 = arith.constant 0 : i32
    %c0_i32_1 = arith.constant 0 : i32
    return %arg0, %c0_i32, %c0_i32_0 : i32, i32, i32
  }
  func.func @transform_2(%arg0: i32) -> (i32, i32) {
    %c0_i32 = arith.constant 0 : i32
    %c0_i32_0 = arith.constant 0 : i32
    %c0_i32_1 = arith.constant 0 : i32
    return %c0_i32, %c0_i32_0 : i32, i32
  }
  func.func @transform_3(%arg0: i32) -> (i32, i32) {
    %c0_i32 = arith.constant 0 : i32
    %c0_i32_0 = arith.constant 0 : i32
    %c0_i32_1 = arith.constant 0 : i32
    return %c0_i32, %c0_i32_0 : i32, i32
  }
  func.func @transform_4(%arg0: i32) -> (i32, i32) {
    %c0_i32 = arith.constant 0 : i32
    %c0_i32_0 = arith.constant 0 : i32
    %c0_i32_1 = arith.constant 0 : i32
    return %c0_i32, %c0_i32_0 : i32, i32
  }
  func.func @transform_5(%arg0: i32) -> (i32, i32, i32) {
    %c0_i32 = arith.constant 0 : i32
    %c0_i32_0 = arith.constant 0 : i32
    %c0_i32_1 = arith.constant 0 : i32
    return %arg0, %c0_i32, %c0_i32_0 : i32, i32, i32
  }
  func.func @transform_6(%arg0: i32) -> (i32, i32, i32) {
    %c0_i32 = arith.constant 0 : i32
    %c0_i32_0 = arith.constant 0 : i32
    %c0_i32_1 = arith.constant 0 : i32
    return %arg0, %c0_i32, %c0_i32_0 : i32, i32, i32
  }
  func.func @transform_7(%arg0: i32) -> (i32, i32, i32) {
    %c0_i32 = arith.constant 0 : i32
    %c0_i32_0 = arith.constant 0 : i32
    %c0_i32_1 = arith.constant 0 : i32
    return %arg0, %c0_i32, %c0_i32_0 : i32, i32, i32
  }
}

</mosaic_0001>

<bundles_post_ra>
// kernel: tpu_custom_call.1
= control target key start
LH: loop header
LB: loop body
LE: loop exit
PB: predicated region body
PF: predicated region fallthrough
CT: control target
= control target key end

     0   :  { %s1809_s0 = inlined_call_operand.hbm [shape: f32[2,16,16], index: 0, kind: input, shape index: {}]   ;;  %s1810_s1 = inlined_call_operand.hbm [shape: f32[2,16,16], index: 1, kind: input, shape index: {}]   ;;  %s1811_s2 = inlined_call_operand.hbm [shape: f32[16,32], index: 2, kind: input, shape index: {}]   ;;  %s1812_s3 = inlined_call_operand.vmem [shape: f32[1,32], index: 3, kind: input, shape index: {}]   ;;  %s1813_s4 = inlined_call_operand.vmem [shape: f32[2,32], index: 4, kind: input, shape index: {}]   ;;  %s1814_s5 = inlined_call_operand.hbm [shape: f32[2,8,32], index: 5, kind: output, shape index: {0}]   ;;  %s1815_s6 = inlined_call_operand.hbm [shape: f32[2,8,8], index: 6, kind: output, shape index: {1}]   ;;  %s1816_s7 = inlined_call_operand.hbm [shape: f32[2,1,64], index: 7, kind: output, shape index: {2}]  }
   0x1   :  { %1825 = sst [smem:[#allocation20_spill]] %s1809_s0 }
   0x2   :  { %1826 = sst [smem:[#allocation21_spill]] %s1811_s2 }
   0x3   :  { %13 = vsyncpa [#allocation3], 0 }
   0x4   :  { %15 = vsyncpa [#allocation3 + $0x1], 0 }
   0x5   :  { %16 = vsyncpa [#allocation6], 0 }
   0x6   :  { %18 = vsyncpa [#allocation6 + $0x1], 0 }
   0x7   :  { %19 = vsyncpa [#allocation4], 0 }
   0x8   :  { %21 = vsyncpa [#allocation4 + $0x1], 0 }
   0x9   :  { %22 = vsyncpa [#allocation10], 0 }
   0xa   :  { %24 = vsyncpa [#allocation10 + $0x1], 0  ;;  %s1468_s24 = smov 0   ;;  %s1470_s25 = smov 0  }
   0xb   :  { %s1472_s26 = smov 0   ;;  %s1474_s27 = smov 0  }
   0xc LB: > { %1827 = sst [smem:[#allocation17_spill]] %s1417_s26  ;;  %s1489_s28 = sadd.s32 4294967295, %s1421_s27   ;;  %s1421_s27 = sphi %s1474_s27, %s1841_s27   ;;  %s1417_s26 = sphi %s1472_s26, %s1843_s26   ;;  %s1413_s25 = sphi %s1470_s25, %s1845_s25   ;;  %s1409_s24 = sphi %s1468_s24, %s1844_s24  }
   0xd   : > { %s1817_s29 = sadd.s32 4294967294, %s1421_s27   ;;  %p50_p0 = scmp.ne.s32.totalorder %s1413_s25, %s1409_s24 }
   0xe   : > { %p51_p1 = scmp.eq.s32.totalorder %s1489_s28, 0  ;;  %p163_p2 = scmp.eq.s32.totalorder %s1489_s28, 1 }
   0xf   : > { %p169_p3 = scmp.eq.s32.totalorder %s1817_s29, 1  ;;  %p1072_p5 = scmp.ge.s32.totalorder %s1421_s27, 1 }
  0x10   : > { %p1500_p4 = por %p51_p1, %p50_p0  ;;  %p228_p7 = scmp.lt.s32.totalorder %s1421_s27, 3 }
  0x11   : > { %p1505_p6 = por %p169_p3, %p50_p0  ;;  %s1830_s2 = sld [smem:[#allocation21_spill]] }
  0x12   : > { %p1513_p8 = pnand %p1072_p5, %p228_p7  ;;  %s1423_s13 = smov [#allocation7]  }
  0x13   : > { %s241_s14 = sshll.u32 %s1423_s13, 4  ;;  %s1523_s15 = sadd.s32 1, %s1421_s27   ;;  %s242_s14 = int_to_ptr.vmem [resolvable:$true] %s241_s14 }
  0x14   : > { %p1126_p9 = pneg %p1513_p8  ;;  %1832 = sst [smem:[#allocation18_spill]] %s1523_s15 }
  0x15   : > { %s1818_s16 = smov 128   ;;  %s1820_s17 = smov 8  }
  0x16   : > { %p1127_p10 = pnand %p1126_p9, %p51_p1  ;;  %s34_s18 = ssub.s32 %s1421_s27, %s1523_s15 }
  0x17   : > { %s239_s11 = sshll.u32 %s1830_s2, 4  ;;  %s37_s19 = sadd.s32 1, %s1417_s26  ;;  %s240_s11 = int_to_ptr.hbm [resolvable:$true] %s239_s11 }
  0x18   : > { %1129 = dma.hbm_to_vmem [thread:$0]  (!%p1127_p10), %s240_s11, 256, %s242_s14, [#allocation6], %s1818_s16, %s1818_s16, %s1820_s17  }
  0x19   : > { %p35_p12 = scmp.eq.s32.totalorder %s34_s18, 0  ;;  %p44_p13 = scmp.ne.s32.totalorder %s1417_s26, %s1413_s25 }
  0x1a   : > { %p45_p0 = scmp.eq.s32.totalorder %s1421_s27, 0  ;;  %p1148_p3 = scmp.lt.s32.totalorder %s1421_s27, 2 }
  0x1b   : > { %s1536_s20 = scalar_select %p35_p12, %s1417_s26, %s37_s19  }
  0x1c   : > { %p46_p5 = por %p45_p0, %p44_p13  ;;  %p1540_p7 = por %p163_p2, %p44_p13 }
  0x1d   : > { %1833 = sst [smem:[#allocation19_spill]] %s1536_s20  ;;  %s261_s22 = sand.u32 1, %s1417_s26  }
  0x1e   : > { %s1110_s23 = sshll.u32 %s1421_s27, 4  ;;  %s1075_s9 = sshll.u32 %s261_s22, 4 }
  0x1f   : > { %s1835_s0 = sld [smem:[#allocation20_spill]]  ;;  %s265_s18 = scalar_lea.vmem [#allocation2], %s1075_s9 }
  0x20   : > { %s273_s29 = sshll.u32 %s265_s18, 4  ;;  %p1551_p9 = pnand %p1148_p3, %p46_p5  ;;  %s274_s29 = int_to_ptr.vmem [resolvable:$true] %s273_s29 }
  0x21   : > { %s292_s2 = scalar_lea.hbm %s1810_s1, %s1110_s23  ;;  %s287_s20 = scalar_lea.vmem [#allocation5], %s1075_s9 }
  0x22   : > { %s1558_s26 = sshll.u32 %s287_s20, 4  ;;  %s293_s10 = sshll.u32 %s292_s2, 4  ;;  %s294_s10 = int_to_ptr.hbm [resolvable:$true] %s293_s10  ;;  %s296_s26 = int_to_ptr.vmem [resolvable:$true] %s1558_s26 }
  0x23   : > { %s262_s11 = scalar_lea.sflag [#allocation3], %s261_s22  ;;  %p1231_p10 = pneg %p1551_p9 }
  0x25   : > { %s270_s13 = scalar_lea.hbm %s1835_s0, %s1110_s23  ;;  %s1234_s17 = scalar_lea.hbm %s1835_s0, 32 }
  0x26   : > { %s271_s14 = sshll.u32 %s270_s13, 4  ;;  %s272_s14 = int_to_ptr.hbm [resolvable:$true] %s271_s14 }
  0x27   : > { %s1227_s13 = sshra.s32 %s272_s14, 4  ;;  %s1228_s13 = int_to_ptr.hbm [resolvable:$true] %s1227_s13 }
  0x28   : > { %s1229_s18 = scalar_lea.hbm %s1228_s13, 16  ;;  %p1235_p0 = scmp.lt.s32.totalorder %s1228_s13, %s1835_s0 }
  0x29   : > { %p1230_p2 = scmp.ne.s32.totalorder %s1228_s13, %s1229_s18  ;;  %p1236_p3 = scmp.lt.s32.totalorder %s1234_s17, %s1229_s18 }
  0x2b   : > { %p1232_p12 = pnand %p1231_p10, %p1230_p2  ;;  %p1237_p5 = por %p1236_p3, %p1235_p0 }
  0x2d   : > { %p1233_p13 = pneg %p1232_p12 }
  0x2f   : > { %p1238_p11 = pnand %p1237_p5, %p1233_p13 }
  0x31   : > { %1241 = shalt.err (!%p1238_p11)
}
  0x32   : > { %s1837_s2 = smov 8   ;;  %s1838_s20 = smov 128  }
  0x33   : > { %1133 = dma.hbm_to_vmem [thread:$0]  (!%p1551_p9), %s272_s14, 256, %s274_s29, %s262_s11, %s1838_s20, %s1838_s20, %s1837_s2  }
  0x34   : > { %s283_s15 = sand.u32 1, %s1421_s27   ;;  %s1257_s16 = sshra.s32 %s294_s10, 4  ;;  %s1258_s16 = int_to_ptr.hbm [resolvable:$true] %s1257_s16 }
  0x35   : > { %s284_s22 = scalar_lea.sflag [#allocation6], %s283_s15  ;;  %s1259_s13 = scalar_lea.hbm %s1258_s16, 16 }
  0x36   : > { %p1260_p2 = scmp.ne.s32.totalorder %s1258_s16, %s1259_s13  ;;  %s1264_s23 = scalar_lea.hbm %s1810_s1, 32 }
  0x37   : > { %p1265_p13 = scmp.lt.s32.totalorder %s1258_s16, %s1810_s1  ;;  %p1266_p0 = scmp.lt.s32.totalorder %s1264_s23, %s1259_s13 }
  0x38   : > { %p1262_p11 = pnand %p1260_p2, %p1231_p10 }
  0x39   : > { %p1267_p3 = por %p1266_p0, %p1265_p13 }
  0x3a   : > { %p1263_p12 = pneg %p1262_p11 }
  0x3c   : > { %p1268_p5 = pnand %p1267_p3, %p1263_p12 }
  0x3e   : > { %1271 = shalt.err (!%p1268_p5)
}
  0x3f   : > { %1136 = dma.hbm_to_vmem [thread:$0]  (!%p1551_p9), %s294_s10, 256, %s296_s26, %s284_s22, %s1838_s20, %s1838_s20, %s1837_s2  }
  0x40   : > { %307 = sbr.rel (%p1513_p8) target bundleno = 1575 (0x627), region = 40  ;;  %s1595_s29 = sand.u32 (!%p1513_p8), 1, %s1413_s25  }
  0x41   : > { %s1082_s0 = sshll.u32 (!%p1513_p8), %s1595_s29, 4  ;;  %s310_s14 = scalar_lea.sflag (!%p1513_p8), [#allocation3], %s1595_s29 }
  0x42   : > { %s313_s11 = scalar_lea.vmem (!%p1513_p8), [#allocation2], %s1082_s0 }
  0x45   : > { %1388 = dma.done.wait (%p1500_p4), %s310_s14, 256  }
  0x46   : > { %1390 = vsyncadd (%p1500_p4), %s310_s14, 4294967040  ;;  %s319_s26 = sand.u32 1, %s1489_s28   ;;  %s1606_s19 = scalar_lea.vmem [#allocation5], %s1082_s0 }
  0x47   : > { %s320_s12 = scalar_lea.sflag [#allocation6], %s319_s26 }
  0x48   : > { %1392 = dma.done.wait (%p1500_p4), %s320_s12, 256  }
  0x49   : > { %1394 = vsyncadd (%p1500_p4), %s320_s12, 4294967040 }
  0x4a   : > { %1396 = dma.done.wait (%p51_p1), [#allocation6], 256  }
  0x4b   : > { %1398 = vsyncadd (%p51_p1), [#allocation6], 4294967040  ;;  %vm379_vm0 = vcmask 130048   ;;  %v1616_v0 = vld [vmem:[%s313_s11] sm:$0xff]  ;;  %v1620_v2 = vld [vmem:[%s313_s11 + $0x8] sm:$0xff]  ;;  %vm491_vm7 = vcmask 261120  }
  0x4c   : > { %v380_v1 = vsel %vm379_vm0, %v1616_v0, 0.0  ;;  %v383_v3 = vsel %vm379_vm0, %v1620_v2, 0.0  ;;  %v377_v20 = vld [vmem:[%s1606_s19] sm:$0xff]  ;;  %v378_v21 = vld [vmem:[%s1606_s19 + $0x8] sm:$0xff]  ;;  %v410_v27 = vpack.c.bf16 %v1620_v2, %v1616_v0  ;;  %vm702_vm15 = vcmask 1040384   ;;  %s1085_s15 = sshll.u32 %s1595_s29, 3 }
  0x4d   : > { %381 = vadd.xlane.f32.xlu0 %v380_v1  ;;  %v438_v28 = vld [vmem:[#allocation7] sm:$0xff]  ;;  %v439_v29 = vld [vmem:[#allocation7 + $0x8] sm:$0xff]  ;;  %s1711_s22 = scalar_lea.vmem [#allocation8], %s1085_s15  ;;  %s1427_s16 = smov 32  }
  0x4e   : > { %v440_v30 = vpack.c.bf16 %v439_v29, %v438_v28  ;;  %v1188_v43 = vld [vmem:[%s1812_s3] ss:$0 sm:$0xff]  ;;  %s373_s13 = scalar_lea.vmem [#allocation11], %s1595_s29  ;;  %s1106_s18 = sshll.u32 %s1489_s28, 3 }
  0x4f   : > { %s879_s9 = scalar_lea.hbm %s1814_s5, %s1106_s18  ;;  %s881_s0 = sshll.u32 %s1711_s22, 4  ;;  %s882_s0 = int_to_ptr.vmem [resolvable:$true] %s881_s0 }
  0x50   : > { %455 = vmatpush.bf16.msra.mxu1 %v440_v30  ;;  %s883_s14 = sshll.u32 %s879_s9, 4  ;;  %s860_s11 = scalar_lea.sflag [#allocation4], %s1595_s29  ;;  %s884_s14 = int_to_ptr.hbm [resolvable:$true] %s883_s14 }
  0x51   : > { %s1301_s12 = sshra.s32 %s884_s14, 4  ;;  %s1307_s2 = scalar_lea.hbm %s1814_s5, 16  ;;  %s1302_s12 = int_to_ptr.hbm [resolvable:$true] %s1301_s12 }
  0x52   : > { %s1303_s19 = scalar_lea.hbm %s1302_s12, 8  ;;  %p1308_p9 = scmp.lt.s32.totalorder %s1302_s12, %s1814_s5 }
  0x53   : > { %p1304_p1 = scmp.ne.s32.totalorder %s1302_s12, %s1303_s19  ;;  %p1309_p10 = scmp.lt.s32.totalorder %s1307_s2, %s1303_s19 }
  0x55   : > { %384 = vadd.xlane.f32.xlu0 %v383_v3  ;;  %v498_v3 = vlaneseq  ;;  %p1305_p4 = pnand %p1304_p1, %p1540_p7  ;;  %p1310_p2 = por %p1309_p10, %p1308_p9 }
  0x57   : > { %p1306_p8 = pneg %p1305_p4 }
  0x59   : > { %p1311_p11 = pnand %p1310_p2, %p1306_p8 }
  0xc0   : > { %v382_v4 = vpop.xlane.xlu0 %381 }
  0xc1   : > { %v386_v5 = vadd.f32 1.0, %v382_v4 }
  0xc3   : > { %1189 = vrsqrt.f32 %v386_v5  ;;  %vm394_vm2 = vweird.f32 %v386_v5 }
  0xc8   : > { %v385_v6 = vpop.xlane.xlu0 %384 }
  0xc9   : > { %v1190_v7 = vpop.eup %1189  ;;  %v387_v8 = vadd.f32 1.0, %v385_v6 }
  0xca   : > { %v389_v9 = vmul.f32 %v1190_v7, %v386_v5  ;;  %vm395_vm1 = vweird.f32 %v1190_v7 }
  0xcb   : > { %1191 = vrsqrt.f32 %v387_v8  ;;  %vm396_vm4 = vmor %vm394_vm2, %vm395_vm1  ;;  %vm404_vm5 = vweird.f32 %v387_v8 }
  0xcc   : > { %v390_v10 = vmul.f32 %v1190_v7, %v389_v9 }
  0xce   : > { %v391_v11 = vmul.f32 0.5, %v390_v10 }
  0xd0   : > { %v392_v13 = vsub.f32 1.5, %v391_v11 }
  0xd1   : > { %v1192_v12 = vpop.eup %1191 }
  0xd2   : > { %v399_v14 = vmul.f32 %v1192_v12, %v387_v8  ;;  %v393_v16 = vmul.f32 %v1190_v7, %v392_v13  ;;  %vm405_vm3 = vweird.f32 %v1192_v12 }
  0xd3   : > { %vm406_vm6 = vmor %vm404_vm5, %vm405_vm3 }
  0xd4   : > { %v400_v15 = vmul.f32 %v1192_v12, %v399_v14  ;;  %v397_v22 = vsel %vm396_vm4, %v1190_v7, %v393_v16  ;;  %v1638_v7 = vshrl.u32 %v498_v3, 7 }
  0xd5   : > { %v411_v24 = vmul.f32 %v397_v22, %v377_v20  ;;  %v408_v32 = vmul.f32 %v397_v22, %v397_v22 }
  0xd6   : > { %v401_v17 = vmul.f32 0.5, %v400_v15  ;;  %v500_v10 = vadd.s32 8, %v1638_v7  ;;  %v1642_v13 = vcvt.s32.f32 %v1638_v7 }
  0xd7   : > { %v433_v36 = vmul.f32 %v408_v32, %v377_v20 }
  0xd8   : > { %v402_v18 = vsub.f32 1.5, %v401_v17  ;;  %v1644_v14 = vcvt.s32.f32 %v500_v10 }
  0xda   : > { %v403_v19 = vmul.f32 %v1192_v12, %v402_v18 }
  0xdc   : > { %v407_v23 = vsel %vm406_vm6, %v1192_v12, %v403_v19  ;;  %vm704_vm6 = vcmask 1041408  }
  0xdd   : > { %v412_v25 = vmul.f32 %v407_v23, %v378_v21  ;;  %v409_v33 = vmul.f32 %v407_v23, %v407_v23 }
  0xdf   : > { %v413_v26 = vpack.c.bf16 %v412_v25, %v411_v24  ;;  %v434_v37 = vmul.f32 %v409_v33, %v378_v21 }
  0xe1   : > { %424 = vmatpush.bf16.msra.mxu0 %v413_v26 }
  0xe4   : > { %1087 = vmatmul.msk.bf16.vlgmr.msra.gmra.mxu0 %vm379_vm0, %v410_v27 }
 0x161   : > { %v426_v31 = vpop.f32.mrf.mxu0 }
 0x162   : > { %v431_v34 = vmul.f32 %v426_v31, %v397_v22 }
 0x164   : > { %v435_v39 = vadd.f32 %v433_v36, %v431_v34 }
 0x169   : > { %v428_v35 = vpop.f32.mrf.mxu0 }
 0x16a   : > { %v432_v38 = vmul.f32 %v428_v35, %v407_v23 }
 0x16c   : > { %v436_v40 = vadd.f32 %v434_v37, %v432_v38  ;;  %v1652_v38 = vand.u32 127, %v498_v3 }
 0x16e   : > { %v437_v41 = vpack.c.bf16 %v436_v40, %v435_v39 }
 0x170   : > { %1088 = vmatmul.msk.bf16.vlgmr.msra.gmra.mxu1 %vm379_vm0, %v437_v41  ;;  %v1655_v41 = vcvt.s32.f32 %v1652_v38 }
 0x1ed   : > { %v457_v42 = vpop.f32.mrf.mxu1 }
 0x1ee   : > { %v458_v44 = vadd.f32 %v1188_v43, %v457_v42 }
 0x1f0   : > { %v462_v46 = vmax.f32 %v458_v44, 0.0 }
 0x1f2   : > { %v464_v49 = vmul.f32 %v462_v46, %v397_v22  ;;  %v483_v54 = vmul.f32 %v462_v46, %v408_v32 }
 0x1f5   : > { %v459_v45 = vpop.f32.mrf.mxu1 }
 0x1f6   : > { %v460_v47 = vadd.f32 %v1188_v43, %v459_v45  ;;  %v1426_v45 = vmov 0.0  }
 0x1f8   : > { %v463_v48 = vmax.f32 %v460_v47, 0.0 }
 0x1fa   : > { %733 = vmatpush.msra.mxu3 %v463_v48  ;;  %v465_v50 = vmul.f32 %v463_v48, %v407_v23  ;;  %v484_v60 = vmul.f32 %v463_v48, %v409_v33 }
 0x1fc   : > { %734 = vmatpush.msra.mxu3 %v462_v46  ;;  %v466_v51 = vpack.c.bf16 %v465_v50, %v464_v49 }
 0x1fe   : > { %753 = vmatpush.msrb.mxu3 %v1620_v2  ;;  %474 = vmatpush.bf16.msra.mxu2 %v466_v51 }
 0x200   : > { %754 = vmatpush.msrb.mxu3 %v1616_v0 }
 0x201   : > { %1089 = vmatmul.msk.bf16.vlgmr.msra.gmra.mxu2 %vm379_vm0, %v410_v27 }
 0x284   : > { %v476_v52 = vpop.f32.mrf.mxu2 }
 0x285   : > { %v481_v53 = vmul.f32 %v476_v52, %v397_v22 }
 0x287   : > { %v485_v55 = vadd.f32 %v483_v54, %v481_v53 }
 0x289   : > { %v487_v56 = vsub.f32 %v462_v46, %v485_v55 }
 0x28b   : > { %v489_v57 = vand.u32 2147483647, %v487_v56 }
 0x28c   : > { %v478_v58 = vpop.f32.mrf.mxu2 }
 0x28d   : > { %v482_v59 = vmul.f32 %v478_v58, %v407_v23  ;;  %v492_v61 = vsel %vm491_vm7, %v489_v57, 0.0 }
 0x28e   : > { %493 = vadd.xlane.f32.xlu1 %v492_v61 }
 0x28f   : > { %v486_v62 = vadd.f32 %v484_v60, %v482_v59 }
 0x291   : > { %v488_v63 = vsub.f32 %v463_v48, %v486_v62 }
 0x293   : > { %v490_v1 = vand.u32 2147483647, %v488_v63 }
 0x295   : > { %v495_v0 = vsel %vm491_vm7, %v490_v1, 0.0 }
 0x296   : > { %496 = vadd.xlane.f32.xlu1 %v495_v0 }
 0x301   : > { %v494_v2 = vpop.xlane.xlu1 %493 }
 0x309   : > { %v497_v4 = vpop.xlane.xlu1 %496 }
 0x30a   : > { %v506_v5 = vmax.f32 %v494_v2, %v497_v4 }
 0x30c   : > { %v507_v6 = vrot.slane %v506_v5, 4 }
 0x30e   : > { %v508_v8 = vmax.f32 %v506_v5, %v507_v6 }
 0x310   : > { %v509_v9 = vrot.slane %v508_v8, 2 }
 0x312   : > { %v510_v11 = vmax.f32 %v508_v8, %v509_v9 }
 0x314   : > { %v511_v12 = vrot.slane %v510_v11, 1 }
 0x316   : > { %v512_v15 = vmax.f32 %v510_v11, %v511_v12 }
 0x318   : > { %vm513_vm8 = vcmp.ge.f32.partialorder %v494_v2, %v512_v15  ;;  %vm514_vm9 = vcmp.ge.f32.partialorder %v497_v4, %v512_v15 }
 0x319   : > { %v515_v16 = vsel %vm513_vm8, %v1642_v13, 16.0  ;;  %v516_v17 = vsel %vm514_vm9, %v1644_v14, 16.0 }
 0x31a   : > { %v517_v18 = vmin.f32 %v515_v16, %v516_v17 }
 0x31c   : > { %v518_v19 = vrot.slane %v517_v18, 4 }
 0x31e   : > { %v519_v20 = vmin.f32 %v517_v18, %v518_v19 }
 0x320   : > { %v520_v21 = vrot.slane %v519_v20, 2 }
 0x322   : > { %v521_v22 = vmin.f32 %v519_v20, %v520_v21 }
 0x324   : > { %v522_v23 = vrot.slane %v521_v22, 1 }
 0x326   : > { %v523_v24 = vmin.f32 %v521_v22, %v522_v23 }
 0x328   : > { %vm527_vm10 = vcmp.eq.f32.partialorder %v1642_v13, %v523_v24  ;;  %vm528_vm11 = vcmp.eq.f32.partialorder %v1644_v14, %v523_v24  ;;  %vm524_vm14 = vcmp.eq.f32.partialorder %v1655_v41, %v523_v24 }
 0x329   : > { %v529_v25 = vsel %vm527_vm10, -1e+30, %v494_v2  ;;  %v530_v26 = vsel %vm528_vm11, -1e+30, %v497_v4  ;;  %v1090_v46 = vsel %vm524_vm14, 1.0, %v1426_v45 }
 0x32a   : > { %v531_v27 = vmax.f32 %v529_v25, %v530_v26 }
 0x32c   : > { %v532_v28 = vrot.slane %v531_v27, 4 }
 0x32e   : > { %v533_v29 = vmax.f32 %v531_v27, %v532_v28 }
 0x330   : > { %v534_v30 = vrot.slane %v533_v29, 2 }
 0x332   : > { %v535_v31 = vmax.f32 %v533_v29, %v534_v30 }
 0x334   : > { %v536_v32 = vrot.slane %v535_v31, 1 }
 0x336   : > { %v537_v33 = vmax.f32 %v535_v31, %v536_v32 }
 0x338   : > { %vm538_vm12 = vcmp.ge.f32.partialorder %v529_v25, %v537_v33  ;;  %vm539_vm13 = vcmp.ge.f32.partialorder %v530_v26, %v537_v33 }
 0x339   : > { %v540_v34 = vsel %vm538_vm12, %v1642_v13, 16.0  ;;  %v541_v35 = vsel %vm539_vm13, %v1644_v14, 16.0  ;;  %vm706_vm13 = vcmask 1042432  }
 0x33a   : > { %v542_v36 = vmin.f32 %v540_v34, %v541_v35 }
 0x33c   : > { %v543_v37 = vrot.slane %v542_v36, 4 }
 0x33e   : > { %v544_v39 = vmin.f32 %v542_v36, %v543_v37 }
 0x340   : > { %v545_v40 = vrot.slane %v544_v39, 2 }
 0x342   : > { %v546_v42 = vmin.f32 %v544_v39, %v545_v40 }
 0x344   : > { %v547_v43 = vrot.slane %v546_v42, 1 }
 0x346   : > { %v548_v44 = vmin.f32 %v546_v42, %v547_v43 }
 0x348   : > { %vm549_vm1 = vcmp.eq.f32.partialorder %v1655_v41, %v548_v44  ;;  %vm552_vm2 = vcmp.eq.f32.partialorder %v1642_v13, %v548_v44  ;;  %vm553_vm3 = vcmp.eq.f32.partialorder %v1644_v14, %v548_v44 }
 0x349   : > { %v1091_v47 = vsel %vm549_vm1, 1.0, %v1426_v45  ;;  %v554_v48 = vsel %vm552_vm2, -1e+30, %v529_v25  ;;  %v555_v49 = vsel %vm553_vm3, -1e+30, %v530_v26 }
 0x34a   : > { %v556_v50 = vmax.f32 %v554_v48, %v555_v49  ;;  %v703_v51 = vsel %vm702_vm15, %v1090_v46, %v1091_v47 }
 0x34c   : > { %v557_v52 = vrot.slane %v556_v50, 4 }
 0x34e   : > { %v558_v53 = vmax.f32 %v556_v50, %v557_v52 }
 0x350   : > { %v559_v54 = vrot.slane %v558_v53, 2 }
 0x352   : > { %v560_v55 = vmax.f32 %v558_v53, %v559_v54 }
 0x354   : > { %v561_v56 = vrot.slane %v560_v55, 1 }
 0x356   : > { %v562_v57 = vmax.f32 %v560_v55, %v561_v56 }
 0x358   : > { %vm563_vm4 = vcmp.ge.f32.partialorder %v554_v48, %v562_v57  ;;  %vm564_vm5 = vcmp.ge.f32.partialorder %v555_v49, %v562_v57 }
 0x359   : > { %v565_v58 = vsel %vm563_vm4, %v1642_v13, 16.0  ;;  %v566_v59 = vsel %vm564_vm5, %v1644_v14, 16.0  ;;  %vm708_vm4 = vcmask 1043456  }
 0x35a   : > { %v567_v60 = vmin.f32 %v565_v58, %v566_v59 }
 0x35c   : > { %v568_v61 = vrot.slane %v567_v60, 4 }
 0x35e   : > { %v569_v62 = vmin.f32 %v567_v60, %v568_v61 }
 0x360   : > { %v570_v63 = vrot.slane %v569_v62, 2 }
 0x362   : > { %v571_v1 = vmin.f32 %v569_v62, %v570_v63 }
 0x364   : > { %v572_v0 = vrot.slane %v571_v1, 1 }
 0x366   : > { %v573_v2 = vmin.f32 %v571_v1, %v572_v0 }
 0x368   : > { %vm577_vm8 = vcmp.eq.f32.partialorder %v1642_v13, %v573_v2  ;;  %vm578_vm9 = vcmp.eq.f32.partialorder %v1644_v14, %v573_v2  ;;  %vm574_vm10 = vcmp.eq.f32.partialorder %v1655_v41, %v573_v2 }
 0x369   : > { %v579_v3 = vsel %vm577_vm8, -1e+30, %v554_v48  ;;  %v580_v4 = vsel %vm578_vm9, -1e+30, %v555_v49  ;;  %v1092_v5 = vsel %vm574_vm10, 1.0, %v1426_v45 }
 0x36a   : > { %v581_v6 = vmax.f32 %v579_v3, %v580_v4  ;;  %v705_v8 = vsel %vm704_vm6, %v703_v51, %v1092_v5 }
 0x36c   : > { %v582_v9 = vrot.slane %v581_v6, 4 }
 0x36e   : > { %v583_v10 = vmax.f32 %v581_v6, %v582_v9 }
 0x370   : > { %v584_v11 = vrot.slane %v583_v10, 2 }
 0x372   : > { %v585_v12 = vmax.f32 %v583_v10, %v584_v11 }
 0x374   : > { %v586_v15 = vrot.slane %v585_v12, 1 }
 0x376   : > { %v587_v16 = vmax.f32 %v585_v12, %v586_v15 }
 0x378   : > { %vm588_vm11 = vcmp.ge.f32.partialorder %v579_v3, %v587_v16  ;;  %vm589_vm12 = vcmp.ge.f32.partialorder %v580_v4, %v587_v16 }
 0x379   : > { %v590_v17 = vsel %vm588_vm11, %v1642_v13, 16.0  ;;  %v591_v18 = vsel %vm589_vm12, %v1644_v14, 16.0 }
 0x37a   : > { %v592_v19 = vmin.f32 %v590_v17, %v591_v18 }
 0x37c   : > { %v593_v20 = vrot.slane %v592_v19, 4 }
 0x37e   : > { %v594_v21 = vmin.f32 %v592_v19, %v593_v20 }
 0x380   : > { %v595_v22 = vrot.slane %v594_v21, 2 }
 0x382   : > { %v596_v23 = vmin.f32 %v594_v21, %v595_v22 }
 0x384   : > { %v597_v24 = vrot.slane %v596_v23, 1 }
 0x386   : > { %v598_v25 = vmin.f32 %v596_v23, %v597_v24 }
 0x388   : > { %vm602_vm14 = vcmp.eq.f32.partialorder %v1642_v13, %v598_v25  ;;  %vm603_vm15 = vcmp.eq.f32.partialorder %v1644_v14, %v598_v25  ;;  %vm599_vm1 = vcmp.eq.f32.partialorder %v1655_v41, %v598_v25 }
 0x389   : > { %v604_v26 = vsel %vm602_vm14, -1e+30, %v579_v3  ;;  %v605_v27 = vsel %vm603_vm15, -1e+30, %v580_v4  ;;  %v1093_v28 = vsel %vm599_vm1, 1.0, %v1426_v45 }
 0x38a   : > { %v606_v29 = vmax.f32 %v604_v26, %v605_v27  ;;  %v707_v30 = vsel %vm706_vm13, %v705_v8, %v1093_v28 }
 0x38c   : > { %v607_v31 = vrot.slane %v606_v29, 4 }
 0x38e   : > { %v608_v32 = vmax.f32 %v606_v29, %v607_v31 }
 0x390   : > { %v609_v33 = vrot.slane %v608_v32, 2 }
 0x392   : > { %v610_v34 = vmax.f32 %v608_v32, %v609_v33 }
 0x394   : > { %v611_v35 = vrot.slane %v610_v34, 1 }
 0x396   : > { %v612_v36 = vmax.f32 %v610_v34, %v611_v35 }
 0x398   : > { %vm613_vm2 = vcmp.ge.f32.partialorder %v604_v26, %v612_v36  ;;  %vm614_vm3 = vcmp.ge.f32.partialorder %v605_v27, %v612_v36 }
 0x399   : > { %v615_v37 = vsel %vm613_vm2, %v1642_v13, 16.0  ;;  %v616_v39 = vsel %vm614_vm3, %v1644_v14, 16.0 }
 0x39a   : > { %v617_v40 = vmin.f32 %v615_v37, %v616_v39 }
 0x39c   : > { %v618_v42 = vrot.slane %v617_v40, 4 }
 0x39e   : > { %v619_v43 = vmin.f32 %v617_v40, %v618_v42 }
 0x3a0   : > { %v620_v44 = vrot.slane %v619_v43, 2 }
 0x3a2   : > { %v621_v46 = vmin.f32 %v619_v43, %v620_v44 }
 0x3a4   : > { %v622_v47 = vrot.slane %v621_v46, 1 }
 0x3a6   : > { %v623_v48 = vmin.f32 %v621_v46, %v622_v47 }
 0x3a8   : > { %vm627_vm5 = vcmp.eq.f32.partialorder %v1642_v13, %v623_v48  ;;  %vm628_vm6 = vcmp.eq.f32.partialorder %v1644_v14, %v623_v48  ;;  %vm624_vm8 = vcmp.eq.f32.partialorder %v1655_v41, %v623_v48 }
 0x3a9   : > { %v629_v49 = vsel %vm627_vm5, -1e+30, %v604_v26  ;;  %v630_v50 = vsel %vm628_vm6, -1e+30, %v605_v27  ;;  %v1094_v51 = vsel %vm624_vm8, 1.0, %v1426_v45  ;;  %vm710_vm6 = vcmask 1044480  }
 0x3aa   : > { %v631_v52 = vmax.f32 %v629_v49, %v630_v50  ;;  %v1681_v53 = vsel %vm708_vm4, %v707_v30, %v1094_v51  ;;  %vm712_vm8 = vcmask 1045504   ;;  %v782_v51 = vld [vmem:[%s1813_s4] sm:$0x3] }
 0x3ac   : > { %v632_v54 = vrot.slane %v631_v52, 4 }
 0x3ae   : > { %v633_v55 = vmax.f32 %v631_v52, %v632_v54  ;;  %v783_v52 = vperm.slane %v782_v51, 0  ;;  %v789_v54 = vrot.slane %v782_v51, 1 }
 0x3b0   : > { %v634_v56 = vrot.slane %v633_v55, 2 }
 0x3b2   : > { %v635_v57 = vmax.f32 %v633_v55, %v634_v56 }
 0x3b4   : > { %v636_v58 = vrot.slane %v635_v57, 1 }
 0x3b6   : > { %v637_v59 = vmax.f32 %v635_v57, %v636_v58 }
 0x3b8   : > { %vm638_vm9 = vcmp.ge.f32.partialorder %v629_v49, %v637_v59  ;;  %vm639_vm10 = vcmp.ge.f32.partialorder %v630_v50, %v637_v59 }
 0x3b9   : > { %v640_v60 = vsel %vm638_vm9, %v1642_v13, 16.0  ;;  %v641_v61 = vsel %vm639_vm10, %v1644_v14, 16.0  ;;  %vm714_vm9 = vcmask 1046528  }
 0x3ba   : > { %v642_v62 = vmin.f32 %v640_v60, %v641_v61 }
 0x3bc   : > { %v643_v63 = vrot.slane %v642_v62, 4 }
 0x3be   : > { %v644_v1 = vmin.f32 %v642_v62, %v643_v63 }
 0x3c0   : > { %v645_v0 = vrot.slane %v644_v1, 2 }
 0x3c2   : > { %v646_v2 = vmin.f32 %v644_v1, %v645_v0 }
 0x3c4   : > { %v647_v3 = vrot.slane %v646_v2, 1 }
 0x3c6   : > { %v648_v4 = vmin.f32 %v646_v2, %v647_v3 }
 0x3c8   : > { %vm652_vm11 = vcmp.eq.f32.partialorder %v1642_v13, %v648_v4  ;;  %vm653_vm12 = vcmp.eq.f32.partialorder %v1644_v14, %v648_v4  ;;  %vm649_vm4 = vcmp.eq.f32.partialorder %v1655_v41, %v648_v4 }
 0x3c9   : > { %v654_v5 = vsel %vm652_vm11, -1e+30, %v629_v49  ;;  %v655_v6 = vsel %vm653_vm12, -1e+30, %v630_v50  ;;  %v1095_v46 = vsel %vm649_vm4, 1.0, %v1426_v45  ;;  %vm857_vm11 = vcmask 516096  }
 0x3ca   : > { %v656_v8 = vmax.f32 %v654_v5, %v655_v6  ;;  %vm821_vm12 = vcmask 64512  }
 0x3cc   : > { %v657_v9 = vrot.slane %v656_v8, 4 }
 0x3ce   : > { %v658_v10 = vmax.f32 %v656_v8, %v657_v9 }
 0x3d0   : > { %v659_v11 = vrot.slane %v658_v10, 2 }
 0x3d2   : > { %v660_v12 = vmax.f32 %v658_v10, %v659_v11 }
 0x3d4   : > { %v661_v15 = vrot.slane %v660_v12, 1 }
 0x3d6   : > { %v662_v16 = vmax.f32 %v660_v12, %v661_v15 }
 0x3d8   : > { %vm663_vm13 = vcmp.ge.f32.partialorder %v654_v5, %v662_v16  ;;  %vm664_vm14 = vcmp.ge.f32.partialorder %v655_v6, %v662_v16 }
 0x3d9   : > { %v665_v17 = vsel %vm663_vm13, %v1642_v13, 16.0  ;;  %v666_v18 = vsel %vm664_vm14, %v1644_v14, 16.0 }
 0x3da   : > { %v667_v19 = vmin.f32 %v665_v17, %v666_v18 }
 0x3dc   : > { %v668_v20 = vrot.slane %v667_v19, 4 }
 0x3de   : > { %v669_v21 = vmin.f32 %v667_v19, %v668_v20 }
 0x3e0   : > { %v670_v22 = vrot.slane %v669_v21, 2 }
 0x3e2   : > { %v671_v23 = vmin.f32 %v669_v21, %v670_v22 }
 0x3e4   : > { %v672_v24 = vrot.slane %v671_v23, 1 }
 0x3e6   : > { %v673_v25 = vmin.f32 %v671_v23, %v672_v24 }
 0x3e8   : > { %vm677_vm15 = vcmp.eq.f32.partialorder %v1642_v13, %v673_v25  ;;  %vm678_vm1 = vcmp.eq.f32.partialorder %v1644_v14, %v673_v25  ;;  %vm674_vm5 = vcmp.eq.f32.partialorder %v1655_v41, %v673_v25 }
 0x3e9   : > { %v679_v26 = vsel %vm677_vm15, -1e+30, %v654_v5  ;;  %v680_v27 = vsel %vm678_vm1, -1e+30, %v655_v6  ;;  %v1096_v47 = vsel %vm674_vm5, 1.0, %v1426_v45 }
 0x3ea   : > { %v681_v28 = vmax.f32 %v679_v26, %v680_v27 }
 0x3ec   : > { %v682_v29 = vrot.slane %v681_v28, 4 }
 0x3ee   : > { %v683_v30 = vmax.f32 %v681_v28, %v682_v29 }
 0x3f0   : > { %v684_v31 = vrot.slane %v683_v30, 2 }
 0x3f2   : > { %v685_v32 = vmax.f32 %v683_v30, %v684_v31 }
 0x3f4   : > { %v686_v33 = vrot.slane %v685_v32, 1 }
 0x3f6   : > { %v687_v34 = vmax.f32 %v685_v32, %v686_v33 }
 0x3f8   : > { %vm688_vm2 = vcmp.ge.f32.partialorder %v679_v26, %v687_v34  ;;  %vm689_vm3 = vcmp.ge.f32.partialorder %v680_v27, %v687_v34 }
 0x3f9   : > { %v690_v35 = vsel %vm688_vm2, %v1642_v13, 16.0  ;;  %v691_v36 = vsel %vm689_vm3, %v1644_v14, 16.0  ;;  %v711_v13 = vsel %vm710_vm6, %v1681_v53, %v1095_v46 }
 0x3fa   : > { %v692_v37 = vmin.f32 %v690_v35, %v691_v36  ;;  %v713_v49 = vsel %vm712_vm8, %v711_v13, %v1096_v47 }
 0x3fc   : > { %v693_v39 = vrot.slane %v692_v37, 4 }
 0x3fe   : > { %v694_v40 = vmin.f32 %v692_v37, %v693_v39 }
 0x400   : > { %v695_v42 = vrot.slane %v694_v40, 2 }
 0x402   : > { %v696_v43 = vmin.f32 %v694_v40, %v695_v42 }
 0x404   : > { %v697_v44 = vrot.slane %v696_v43, 1 }
 0x406   : > { %v698_v48 = vmin.f32 %v696_v43, %v697_v44 }
 0x408   : > { %vm699_vm10 = vcmp.eq.f32.partialorder %v1655_v41, %v698_v48 }
 0x409   : > { %v1097_v14 = vsel %vm699_vm10, 1.0, %v1426_v45 }
 0x40a   : > { %v715_v50 = vsel %vm714_vm9, %v713_v49, %v1097_v14 }
 0x40b   : > { %1098 = vmatmul.msk.f32.vlgmr.msra.gmra.mxu3 %vm379_vm0, %v715_v50  ;;  %1100 = vmatpush.xpose.msk.msrb.mxu0 %vm379_vm0, %v715_v50 }
 0x413   : > { %1099 = vmatmul.msk.f32.vlgmr.msrb.gmra.mxu3 %vm379_vm0, %v715_v50 }
 0x48e   : > { %v736_v41 = vpop.f32.mrf.mxu3 }
 0x48f   : > { %v844_v53 = vsel %vm491_vm7, %v736_v41, 0.0  ;;  %1102 = vmatpush.xpose.msk.msrb.mxu1 %vm491_vm7, %v736_v41  ;;  %v784_v45 = vmul.f32 %v783_v52, %v736_v41  ;;  %835 = vst.msk [vmem:[%s1711_s22] sm:$0xff] %vm491_vm7, %v736_v41  ;;  %v837_v1 = vsel %vm491_vm7, %v736_v41, -inf }
 0x490   : > { %v845_v55 = vrot.slane %v844_v53, 4  ;;  %v838_v0 = vrot.slane %v837_v1, 4 }
 0x491   : > { %v785_v56 = vsel %vm491_vm7, %v784_v45, 0.0 }
 0x492   : > { %1103 = vmatmul.msk.f32.vlgmr.msrb.gmra.mxu1 %vm491_vm7, %v789_v54  ;;  %786 = vadd.xlane.f32.xlu2 %v785_v56  ;;  %v846_v57 = vadd.f32 %v845_v55, %v844_v53  ;;  %v839_v2 = vmax.f32 %v837_v1, %v838_v0 }
 0x494   : > { %v847_v58 = vrot.slane %v846_v57, 2  ;;  %v840_v3 = vrot.slane %v839_v2, 2 }
 0x496   : > { %v756_v59 = vpop.f32.mrf.mxu3  ;;  %v848_v60 = vadd.f32 %v847_v58, %v846_v57  ;;  %v841_v4 = vmax.f32 %v839_v2, %v840_v3 }
 0x497   : > { %1101 = vmatmul.msk.f32.vlgmr.msrb.gmra.mxu0 %vm379_vm0, %v756_v59 }
 0x498   : > { %v849_v61 = vrot.slane %v848_v60, 1  ;;  %v842_v5 = vrot.slane %v841_v4, 1 }
 0x49a   : > { %v850_v62 = vadd.f32 %v849_v61, %v848_v60  ;;  %v843_v8 = vmax.f32 %v841_v4, %v842_v5 }
 0x49c   : > { %v851_v63 = vmul.f32 0.125, %v850_v62 }
 0x49e   : > { %853 = vrot.lane.b32.xlu1 %v851_v63, %s1427_s16 }
 0x505   : > { %v787_v11 = vpop.xlane.xlu2 %786 }
 0x50f   : > { %v812_v6 = vpop.f32.mrf.mxu1 }
 0x510   : > { %v815_v9 = vperm.slane %v812_v6, 0  ;;  %v854_v10 = vpop.permute.xlu1 %853 }
 0x511   : > { %v856_v12 = vsel %vm491_vm7, %v843_v8, %v854_v10 }
 0x512   : > { %v816_v15 = vadd.f32 %v815_v9, %v787_v11  ;;  %858 = vst.msk [vmem:[%s373_s13] sm:$0x1] %vm857_vm11, %v856_v12 }
 0x514   : > { %vm817_vm0 = vcmp.gt.f32.partialorder %v816_v15, 0.0  ;;  %v818_v16 = vmul.f32 0.2, %v816_v15  ;;  %v779_v17 = vpop.f32.mrf.mxu0 }
 0x516   : > { %v819_v18 = vsel %vm817_vm0, %v816_v15, %v818_v16 }
 0x517   : > { %v820_v19 = vadd.f32 %v819_v18, %v779_v17 }
 0x519   : > { %v822_v20 = vsel %vm821_vm12, %v820_v19, -inf }
 0x51a   : > { %823 = vmax.xlane.f32.xlu2 %v822_v20 }
 0x58d   : > { %v824_v21 = vpop.xlane.xlu2 %823 }
 0x58e   : > { %v825_v22 = vsub.f32 %v820_v19, %v824_v21 }
 0x590   : > { %v826_v23 = vmul.f32 1.442695, %v825_v22 }
 0x592   : > { %1193 = vpow2.f32 %v826_v23 }
 0x598   : > { %v1194_v24 = vpop.eup %1193 }
 0x599   : > { %v828_v25 = vsel %vm821_vm12, %v1194_v24, 0.0 }
 0x59a   : > { %829 = vadd.xlane.f32.xlu0 %v828_v25 }
 0x59b   : > { %1314 = shalt.err (!%p1311_p11)
}
 0x59c   : > { %1120 = dma.vmem_to_hbm [thread:$0]  (%p1540_p7), %s882_s0, 128, %s884_s14, %s860_s11   ;;  %vm833_vm7 = vcmp.eq.s32.totalorder %v1638_v7, %v1652_v38 }
 0x59d   : > { %s893_s23 = scalar_lea.hbm %s1815_s6, %s1106_s18  ;;  %s906_s12 = scalar_lea.hbm %s1816_s7, %s1489_s28 }
 0x59e   : > { %s367_s19 = scalar_lea.vmem [#allocation9], %s1085_s15  ;;  %s897_s2 = sshll.u32 %s893_s23, 4  ;;  %s898_s2 = int_to_ptr.hbm [resolvable:$true] %s897_s2 }
 0x59f   : > { %s895_s10 = sshll.u32 %s367_s19, 4  ;;  %s1754_s0 = sshll.u32 %s373_s13, 4  ;;  %s896_s10 = int_to_ptr.vmem [resolvable:$true] %s895_s10  ;;  %s909_s0 = int_to_ptr.vmem [resolvable:$true] %s1754_s0 }
 0x5a0   : > { %s1756_s14 = sshll.u32 %s906_s12, 4  ;;  %s865_s15 = scalar_lea.sflag [#allocation10], %s319_s26  ;;  %s911_s14 = int_to_ptr.hbm [resolvable:$true] %s1756_s14 }
 0x5a1   : > { %s1329_s18 = sshra.s32 %s898_s2, 4  ;;  %s1335_s20 = scalar_lea.hbm %s1815_s6, 16  ;;  %s1330_s18 = int_to_ptr.hbm [resolvable:$true] %s1329_s18 }
 0x5a2   : > { %s1331_s11 = scalar_lea.hbm %s1330_s18, 8  ;;  %p1336_p3 = scmp.lt.s32.totalorder %s1330_s18, %s1815_s6 }
 0x5a3   : > { %p1332_p12 = scmp.ne.s32.totalorder %s1330_s18, %s1331_s11  ;;  %p1337_p5 = scmp.lt.s32.totalorder %s1335_s20, %s1331_s11 }
 0x5a5   : > { %p1333_p13 = pnand %p1332_p12, %p1540_p7  ;;  %p1338_p1 = por %p1337_p5, %p1336_p3 }
 0x5a7   : > { %p1334_p0 = pneg %p1333_p13 }
 0x5a9   : > { %p1339_p4 = pnand %p1338_p1, %p1334_p0 }
 0x60d   : > { %v830_v26 = vpop.xlane.xlu0 %829 }
 0x60e   : > { %1195 = vrcp.f32 %v830_v26 }
 0x614   : > { %v1196_v27 = vpop.eup %1195 }
 0x615   : > { %v832_v28 = vmul.f32 %v1196_v27, %v1194_v24 }
 0x617   : > { %v834_v29 = vsel %vm833_vm7, 0.0, %v832_v28 }
 0x618   : > { %836 = vst.msk [vmem:[%s367_s19] sm:$0xff] %vm821_vm12, %v834_v29 }
 0x619   : > { %1342 = shalt.err (!%p1339_p4)
}
 0x61a   : > { %1121 = dma.vmem_to_hbm [thread:$0]  (%p1540_p7), %s896_s10, 128, %s898_s2, %s865_s15  }
 0x61b   : > { %s1357_s28 = sshra.s32 %s911_s14, 4  ;;  %s1363_s9 = scalar_lea.hbm %s1816_s7, 2  ;;  %s1358_s28 = int_to_ptr.hbm [resolvable:$true] %s1357_s28 }
 0x61c   : > { %s1359_s26 = scalar_lea.hbm %s1358_s28, 1  ;;  %p1364_p2 = scmp.lt.s32.totalorder %s1358_s28, %s1816_s7 }
 0x61d   : > { %p1360_p8 = scmp.ne.s32.totalorder %s1358_s28, %s1359_s26  ;;  %p1365_p11 = scmp.lt.s32.totalorder %s1363_s9, %s1359_s26 }
 0x61f   : > { %p1361_p9 = pnand %p1360_p8, %p1540_p7  ;;  %p1366_p12 = por %p1365_p11, %p1364_p2 }
 0x621   : > { %p1362_p10 = pneg %p1361_p9 }
 0x623   : > { %p1367_p13 = pnand %p1366_p12, %p1362_p10 }
 0x625   : > { %1370 = shalt.err (!%p1367_p13)
}
 0x626   : > { %1122 = dma.vmem_to_hbm [thread:$0]  (%p1540_p7), %s909_s0, 16, %s911_s14, %s865_s15  }
 0x627 PF: > { %s922_s19 = sand.u32 1, %s1409_s24   ;;  %p1839_p0 = scmp.ge.s32.totalorder %s1421_s27, 2 }
 0x628   : > { %s923_s10 = scalar_lea.sflag [#allocation4], %s922_s19 }
 0x629   : > { %p1138_p3 = pnand %p1839_p0, %p1505_p6 }
 0x62b   : > { %p1139_p5 = pneg %p1138_p3 }
 0x62d   : > { %1400 = dma.done.wait (%p1139_p5), %s923_s10, 128  }
 0x62e   : > { %1402 = vsyncadd (%p1139_p5), %s923_s10, 4294967168  ;;  %s1840_s2 = sadd.s32 4294967294, %s1421_s27  }
 0x62f   : > { %s932_s21 = sand.u32 1, %s1840_s2  }
 0x630   : > { %s933_s18 = scalar_lea.sflag [#allocation10], %s932_s21 }
 0x631   : > { %1404 = dma.done.wait (%p1139_p5), %s933_s18, 144  }
 0x632   : > { %1406 = vsyncadd (%p1139_p5), %s933_s18, 4294967152  ;;  %s1841_s27 = sld [smem:[#allocation18_spill]]  ;;  %s1844_s24 = smov %s1413_s25 }
 0x633   : > { %s1842_s0 = sld [smem:[#allocation17_spill]] }
 0x634   : > { %s1843_s26 = sld [smem:[#allocation19_spill]] }
 0x638   : > { %p27_p7 = scmp.ge.s32.totalorder %s1841_s27, 4  }
 0x639   : > { %s1845_s25 = smov %s1842_s0 }
 0x63a   :  { %29 = sbr.rel (!%p27_p7) target bundleno = 12 (0xc), region = 134 }
 0x63f   :  { %948 = vsyncpa [#allocation3], 1 }
 0x640   :  { %950 = vsyncpa [#allocation3 + $0x1], 1 }
 0x641   :  { %951 = vsyncpa [#allocation6], 1 }
 0x642   :  { %953 = vsyncpa [#allocation6 + $0x1], 1 }
 0x643   :  { %954 = vsyncpa [#allocation4], 1 }
 0x644   :  { %956 = vsyncpa [#allocation4 + $0x1], 1 }
 0x645   :  { %957 = vsyncpa [#allocation10], 1 }
 0x646   :  { %959 = vsyncpa [#allocation10 + $0x1], 1 }

</bundles_post_ra>
